<compile_context>
chip_gen: v5e
topology: v5e:2x2
jax: 0.10.0
libtpu: 0.0.40
codegen_flags: <defaults>
</compile_context>

<pallas_src>
import functools

import jax
import jax.numpy as jnp
from jax import lax
from jax.experimental import pallas as pl
from jax.experimental.pallas import tpu as pltpu


def _conv_rnn_kernel(x_ref, wc_ref, bc_ref, wih_ref, whh_ref, bg_ref, wd_ref, bd_ref,
                     out_ref, xg_ref, hs_ref, *, lout, dilation, negative_slope,
                     ff_dtype=jnp.float32):
    """Conv (K accumulated matmuls) + LeakyReLU + unrolled batched LSTM + fused dense."""
    H = whh_ref.shape[0]                 # n_hiddens
    K = wc_ref.shape[0]                  # conv kernel size
    Cin = x_ref.shape[2]
    bt = hs_ref.shape[0]                 # batch tile (multiple of 8)
    M = lout * bt

    # ---- Conv1d: K accumulated (L_out*bt, Cin) x (Cin, F) matmuls --------------
    # Time-major input; slicing the (untiled) major dim and merging (lout, bt) is
    # layout-free because bt % 8 == 0, so each matmul is a single well-shaped MXU op.
    conv = None
    for k in range(K):
        xk = x_ref[k * dilation:k * dilation + lout]          # (lout, bt, Cin)
        xk = xk.reshape(M, Cin).astype(ff_dtype)              # free reshape
        part = jnp.dot(xk, wc_ref[k].astype(ff_dtype),
                       preferred_element_type=jnp.float32)    # (M, F)
        conv = part if conv is None else conv + part
    conv = conv + bc_ref[...]                                 # (1, F) broadcast
    act = jnp.where(conv >= 0.0, conv, negative_slope * conv) # LeakyReLU

    # ---- input half of all four LSTM gates: one (M, F) x (F, 4H) matmul --------
    xg_ref[...] = (jnp.dot(act.astype(ff_dtype), wih_ref[...].astype(ff_dtype),
                           preferred_element_type=jnp.float32)
                   + bg_ref[...])                             # (M, 4H)

    # ---- LSTM recurrence: fully unrolled, batched over bt, packed (H,4H) matmul -
    # Kept f32 on the MXU; at tiny H this is latency-bound either way (review #11).
    whh = whh_ref[...]                                        # (H, 4H), loaded once
    h = jnp.zeros((bt, H), jnp.float32)
    c = jnp.zeros((bt, H), jnp.float32)
    for t in range(lout):                                     # static -> static slices
        g = xg_ref[t * bt:(t + 1) * bt, :] + jnp.dot(
            h, whh, preferred_element_type=jnp.float32)       # (bt, 4H)
        sig = jax.nn.sigmoid(g)                               # one EUP pass (i, f, o)
        th = jnp.tanh(g)                                      # one EUP pass (g gate)
        c = sig[:, H:2 * H] * c + sig[:, 0:H] * th[:, 2 * H:3 * H]   # gate order i,f,g,o
        h = sig[:, 3 * H:4 * H] * jnp.tanh(c)
        hs_ref[:, t * H:(t + 1) * H] = h                      # lane-dense stash of h_t

    # ---- flatten + dense: single (bt, L_out*H) x (L_out*H, O) matmul ------------
    out_ref[...] = (jnp.dot(hs_ref[...], wd_ref[...],
                            preferred_element_type=jnp.float32)
                    + bd_ref[...])


def conv_rnn_forward(x, params, *, kernel_size, stride, padding, dilation,
                     n_hiddens, output_size, negative_slope=0.01,
                     batch_tile_cap=128):
    """Wrapper: parameter re-layout (pure glue) + one pallas_call."""
    assert stride == 1, "only stride=1 implemented"   # TODO(synk): stride>1
    B, L, Cin = x.shape
    x = x.astype(jnp.float32)
    if padding > 0:
        x = jnp.pad(x, ((0, 0), (padding, padding), (0, 0)))
    Lin = L + 2 * padding
    lout = (Lin - dilation * (kernel_size - 1) - 1) // stride + 1

    K = kernel_size
    F = params["conv_w"].shape[0]
    H = n_hiddens
    O = output_size
    assert params["dense_w"].shape == (O, lout * H)

    # Batch tile: multiple of 8 (all in-kernel reshapes layout-free), as large as
    # possible, and >=2 grid steps when the batch allows (v7x megacore sharding).
    rup = lambda a, m: -(-a // m) * m
    B8 = max(8, rup(B, 8))
    if B8 >= 16:
        bt = min(batch_tile_cap, rup(B8 // 2, 8))
    else:
        bt = B8
    nb = -(-B8 // bt)
    Bp = nb * bt

    # Time-major layout (folds both PyTorch permutes), batch zero-padded to Bp.
    xt = jnp.transpose(x, (1, 0, 2))                                   # (Lin, B, Cin)
    if Bp > B:
        xt = jnp.pad(xt, ((0, 0), (0, Bp - B), (0, 0)))

    # Parameter re-layout for the channel-last / packed-gate kernel.
    wc = jnp.transpose(params["conv_w"], (2, 1, 0)).astype(jnp.float32)      # (K, Cin, F)
    bc = params["conv_b"].reshape(1, F).astype(jnp.float32)
    wih = params["w_ih"].T.astype(jnp.float32)                               # (F, 4H)
    whh = params["w_hh"].T.astype(jnp.float32)                               # (H, 4H)
    bg = (params["b_ih"] + params["b_hh"]).reshape(1, 4 * H).astype(jnp.float32)
    wd = params["dense_w"].T.astype(jnp.float32)                             # (lout*H, O)
    bd = params["dense_b"].reshape(1, O).astype(jnp.float32)

    kernel = functools.partial(_conv_rnn_kernel, lout=lout, dilation=dilation,
                               negative_slope=negative_slope)

    # Explicit VMEM budget: double-buffered input + resident weights + scratches.
    vmem_est = 4 * (2 * Lin * bt * Cin + K * Cin * F + F + F * 4 * H + H * 4 * H
                    + 4 * H + lout * H * O + O + 2 * bt * O
                    + lout * bt * 4 * H + bt * lout * H)
    vmem_limit = int(min(max(2 * vmem_est, 4 << 20), 64 << 20))

    grid_spec = pltpu.PrefetchScalarGridSpec(
        num_scalar_prefetch=0,
        grid=(nb,),
        in_specs=[
            pl.BlockSpec((Lin, bt, Cin), lambda i: (0, i, 0)),    # raw time-major x
            pl.BlockSpec((K, Cin, F), lambda i: (0, 0, 0)),       # conv weight
            pl.BlockSpec((1, F), lambda i: (0, 0)),               # conv bias
            pl.BlockSpec((F, 4 * H), lambda i: (0, 0)),           # packed W_ih
            pl.BlockSpec((H, 4 * H), lambda i: (0, 0)),           # packed W_hh
            pl.BlockSpec((1, 4 * H), lambda i: (0, 0)),           # packed gate bias
            pl.BlockSpec((lout * H, O), lambda i: (0, 0)),        # flattened dense weight
            pl.BlockSpec((1, O), lambda i: (0, 0)),               # dense bias
        ],
        out_specs=pl.BlockSpec((bt, O), lambda i: (i, 0)),
        scratch_shapes=[
            pltpu.VMEM((lout * bt, 4 * H), jnp.float32),          # precomputed x-gates
            pltpu.VMEM((bt, lout * H), jnp.float32),              # lane-dense stacked h_t
        ],
    )
    out = pl.pallas_call(
        kernel,
        out_shape=jax.ShapeDtypeStruct((Bp, O), jnp.float32),
        grid_spec=grid_spec,
        compiler_params=pltpu.CompilerParams(
            dimension_semantics=("parallel",),                    # megacore on v7x
            vmem_limit_bytes=vmem_limit),
    )(xt, wc, bc, wih, whh, bg, wd, bd)
    return out[:B]


def reference_forward(x, params, *, kernel_size, stride, padding, dilation,
                      n_hiddens, output_size):
    """Pure-JAX reference mirroring the PyTorch forward exactly."""
    B = x.shape[0]
    H = n_hiddens
    xn = jnp.transpose(x, (0, 2, 1))                      # (B, Cin, L) == x.permute(0,2,1)
    conv = lax.conv_general_dilated(
        xn, params["conv_w"], window_strides=(stride,),
        padding=[(padding, padding)], rhs_dilation=(dilation,),
        dimension_numbers=("NCH", "OIH", "NCH"),
        precision=lax.Precision.HIGHEST)
    conv = conv + params["conv_b"][None, :, None]
    act = jnp.where(conv >= 0.0, conv, 0.01 * conv)       # LeakyReLU
    rnn_in = jnp.transpose(act, (0, 2, 1))                # (B, Lout, F)

    W_ih, W_hh = params["w_ih"], params["w_hh"]
    b = params["b_ih"] + params["b_hh"]

    def step(carry, xt):
        h, c = carry
        gates = (jnp.dot(xt, W_ih.T, precision=lax.Precision.HIGHEST)
                 + jnp.dot(h, W_hh.T, precision=lax.Precision.HIGHEST) + b)
        i, f, g, o = jnp.split(gates, 4, axis=-1)
        i, f, g, o = jax.nn.sigmoid(i), jax.nn.sigmoid(f), jnp.tanh(g), jax.nn.sigmoid(o)
        c = f * c + i * g
        h = o * jnp.tanh(c)
        return (h, c), h

    init = (jnp.zeros((B, H), jnp.float32), jnp.zeros((B, H), jnp.float32))
    _, hs = lax.scan(step, init, jnp.transpose(rnn_in, (1, 0, 2)))
    rnn_out = jnp.transpose(hs, (1, 0, 2))                # (B, Lout, H)
    flat = rnn_out.reshape(B, -1)
    return (jnp.dot(flat, params["dense_w"].T, precision=lax.Precision.HIGHEST)
            + params["dense_b"])


if __name__ == "__main__":
    # Small shapes consistent with ConvRnn: seq_len odd so cnn_Lin == seq_len.
    B, seq_len, input_size = 2, 17, 4
    n_filters, kernel_size, stride, padding, dilation = 8, 3, 1, 0, 1
    n_hiddens, output_size = 8, 2
    cnn_lout = (seq_len + 2 * padding - dilation * (kernel_size - 1) - 1) // stride + 1

    key = jax.random.PRNGKey(0)
    ks = jax.random.split(key, 9)
    u = lambda k, shape, s=0.3: jax.random.uniform(k, shape, jnp.float32, -s, s)

    params = {
        "conv_w": u(ks[0], (n_filters, input_size, kernel_size)),      # PyTorch Conv1d (O, I, K)
        "conv_b": u(ks[1], (n_filters,)),
        "w_ih": u(ks[2], (4 * n_hiddens, n_filters)),                  # LSTM weight_ih_l0
        "w_hh": u(ks[3], (4 * n_hiddens, n_hiddens)),                  # LSTM weight_hh_l0
        "b_ih": u(ks[4], (4 * n_hiddens,)),
        "b_hh": u(ks[5], (4 * n_hiddens,)),
        "dense_w": u(ks[6], (output_size, cnn_lout * n_hiddens)),      # nn.Linear weight
        "dense_b": u(ks[7], (output_size,)),
    }
    x = jax.random.normal(ks[8], (B, seq_len, input_size), jnp.float32)

    out = conv_rnn_forward(
        x, params, kernel_size=kernel_size, stride=stride, padding=padding,
        dilation=dilation, n_hiddens=n_hiddens, output_size=output_size)
    out = jax.block_until_ready(out)

    ref = reference_forward(
        x, params, kernel_size=kernel_size, stride=stride, padding=padding,
        dilation=dilation, n_hiddens=n_hiddens, output_size=output_size)
    ref = jax.block_until_ready(ref)

    assert out.shape == (B, output_size)
    assert jnp.allclose(out, ref, atol=2e-3, rtol=2e-3), (out, ref)
    print("KERNEL_OK")
</pallas_src>

<mosaic_0001>
module attributes {stable_mosaic.version = 11 : i64} {
  func.func @_conv_rnn_kernel(%arg0: i32, %arg1: memref<17x8x4xf32, #tpu.memory_space<vmem>>, %arg2: memref<3x4x8xf32, #tpu.memory_space<vmem>>, %arg3: memref<1x8xf32, #tpu.memory_space<vmem>>, %arg4: memref<8x32xf32, #tpu.memory_space<vmem>>, %arg5: memref<8x32xf32, #tpu.memory_space<vmem>>, %arg6: memref<1x32xf32, #tpu.memory_space<vmem>>, %arg7: memref<120x2xf32, #tpu.memory_space<vmem>>, %arg8: memref<1x2xf32, #tpu.memory_space<vmem>>, %arg9: memref<8x2xf32, #tpu.memory_space<vmem>>, %arg10: memref<120x32xf32, #tpu.memory_space<vmem>>, %arg11: memref<8x120xf32, #tpu.memory_space<vmem>>) attributes {dimension_semantics = [#tpu.dimension_semantics<parallel>], iteration_bounds = array<i64: 1>, scalar_prefetch = 0 : i64, scratch_operands = 2 : i64, tpu.core_type = #tpu.core_type<tc>, window_params = [{transform_indices = @transform_0, window_bounds = array<i64: 17, 8, 4>}, {pipeline_mode = #tpu.pipeline_mode<synchronous>, transform_indices = @transform_1, window_bounds = array<i64: 3, 4, 8>}, {pipeline_mode = #tpu.pipeline_mode<synchronous>, transform_indices = @transform_2, window_bounds = array<i64: 1, 8>}, {pipeline_mode = #tpu.pipeline_mode<synchronous>, transform_indices = @transform_3, window_bounds = array<i64: 8, 32>}, {pipeline_mode = #tpu.pipeline_mode<synchronous>, transform_indices = @transform_4, window_bounds = array<i64: 8, 32>}, {pipeline_mode = #tpu.pipeline_mode<synchronous>, transform_indices = @transform_5, window_bounds = array<i64: 1, 32>}, {pipeline_mode = #tpu.pipeline_mode<synchronous>, transform_indices = @transform_6, window_bounds = array<i64: 120, 2>}, {pipeline_mode = #tpu.pipeline_mode<synchronous>, transform_indices = @transform_7, window_bounds = array<i64: 1, 2>}, {transform_indices = @transform_8, window_bounds = array<i64: 8, 2>}]} {
    %c0 = arith.constant 0 : index
    %c0_0 = arith.constant 0 : index
    %c0_1 = arith.constant 0 : index
    %0 = vector.load %arg1[%c0, %c0_0, %c0_1] : memref<17x8x4xf32, #tpu.memory_space<vmem>>, vector<15x8x4xf32>
    %1 = vector.shape_cast %0 : vector<15x8x4xf32> to vector<120x4xf32>
    %c0_2 = arith.constant 0 : index
    %c0_3 = arith.constant 0 : index
    %c0_4 = arith.constant 0 : index
    %2 = vector.load %arg2[%c0_2, %c0_3, %c0_4] : memref<3x4x8xf32, #tpu.memory_space<vmem>>, vector<1x4x8xf32>
    %3 = vector.shape_cast %2 : vector<1x4x8xf32> to vector<4x8xf32>
    %cst = arith.constant dense<0.000000e+00> : vector<120x8xf32>
    %4 = tpu.matmul %1, %3, %cst {dimension_numbers = #tpu.dot_dimension_numbers<[1], [0], [0], [1], [0, 0, 1, 1], [], []>} : vector<120x4xf32>, vector<4x8xf32>, vector<120x8xf32> -> vector<120x8xf32>
    %c1 = arith.constant 1 : index
    %c0_5 = arith.constant 0 : index
    %c0_6 = arith.constant 0 : index
    %5 = vector.load %arg1[%c1, %c0_5, %c0_6] : memref<17x8x4xf32, #tpu.memory_space<vmem>>, vector<15x8x4xf32>
    %6 = vector.shape_cast %5 : vector<15x8x4xf32> to vector<120x4xf32>
    %c1_7 = arith.constant 1 : index
    %c0_8 = arith.constant 0 : index
    %c0_9 = arith.constant 0 : index
    %7 = vector.load %arg2[%c1_7, %c0_8, %c0_9] : memref<3x4x8xf32, #tpu.memory_space<vmem>>, vector<1x4x8xf32>
    %8 = vector.shape_cast %7 : vector<1x4x8xf32> to vector<4x8xf32>
    %cst_10 = arith.constant dense<0.000000e+00> : vector<120x8xf32>
    %9 = tpu.matmul %6, %8, %cst_10 {dimension_numbers = #tpu.dot_dimension_numbers<[1], [0], [0], [1], [0, 0, 1, 1], [], []>} : vector<120x4xf32>, vector<4x8xf32>, vector<120x8xf32> -> vector<120x8xf32>
    %10 = arith.addf %4, %9 : vector<120x8xf32>
    %c2 = arith.constant 2 : index
    %c0_11 = arith.constant 0 : index
    %c0_12 = arith.constant 0 : index
    %11 = vector.load %arg1[%c2, %c0_11, %c0_12] : memref<17x8x4xf32, #tpu.memory_space<vmem>>, vector<15x8x4xf32>
    %12 = vector.shape_cast %11 : vector<15x8x4xf32> to vector<120x4xf32>
    %c2_13 = arith.constant 2 : index
    %c0_14 = arith.constant 0 : index
    %c0_15 = arith.constant 0 : index
    %13 = vector.load %arg2[%c2_13, %c0_14, %c0_15] : memref<3x4x8xf32, #tpu.memory_space<vmem>>, vector<1x4x8xf32>
    %14 = vector.shape_cast %13 : vector<1x4x8xf32> to vector<4x8xf32>
    %cst_16 = arith.constant dense<0.000000e+00> : vector<120x8xf32>
    %15 = tpu.matmul %12, %14, %cst_16 {dimension_numbers = #tpu.dot_dimension_numbers<[1], [0], [0], [1], [0, 0, 1, 1], [], []>} : vector<120x4xf32>, vector<4x8xf32>, vector<120x8xf32> -> vector<120x8xf32>
    %16 = arith.addf %10, %15 : vector<120x8xf32>
    %c0_17 = arith.constant 0 : index
    %c0_18 = arith.constant 0 : index
    %17 = vector.load %arg3[%c0_17, %c0_18] : memref<1x8xf32, #tpu.memory_space<vmem>>, vector<1x8xf32>
    %18 = vector.broadcast %17 : vector<1x8xf32> to vector<120x8xf32>
    %19 = arith.addf %16, %18 : vector<120x8xf32>
    %cst_19 = arith.constant 0.000000e+00 : f32
    %20 = vector.broadcast %cst_19 : f32 to vector<120x8xf32>
    %21 = arith.cmpf oge, %19, %20 : vector<120x8xf32>
    %cst_20 = arith.constant 0.00999999977 : f32
    %22 = vector.broadcast %cst_20 : f32 to vector<120x8xf32>
    %23 = arith.mulf %22, %19 : vector<120x8xf32>
    %24 = arith.select %21, %19, %23 : vector<120x8xi1>, vector<120x8xf32>
    %c0_21 = arith.constant 0 : index
    %c0_22 = arith.constant 0 : index
    %25 = vector.load %arg4[%c0_21, %c0_22] : memref<8x32xf32, #tpu.memory_space<vmem>>, vector<8x32xf32>
    %cst_23 = arith.constant dense<0.000000e+00> : vector<120x32xf32>
    %26 = tpu.matmul %24, %25, %cst_23 {dimension_numbers = #tpu.dot_dimension_numbers<[1], [0], [0], [1], [0, 0, 1, 1], [], []>} : vector<120x8xf32>, vector<8x32xf32>, vector<120x32xf32> -> vector<120x32xf32>
    %c0_24 = arith.constant 0 : index
    %c0_25 = arith.constant 0 : index
    %27 = vector.load %arg6[%c0_24, %c0_25] : memref<1x32xf32, #tpu.memory_space<vmem>>, vector<1x32xf32>
    %28 = vector.broadcast %27 : vector<1x32xf32> to vector<120x32xf32>
    %29 = arith.addf %26, %28 : vector<120x32xf32>
    %c0_26 = arith.constant 0 : index
    %c0_27 = arith.constant 0 : index
    %30 = vector.load %arg10[%c0_26, %c0_27] : memref<120x32xf32, #tpu.memory_space<vmem>>, vector<120x32xf32>
    tpu.vector_store %arg10[%c0_26, %c0_27], %29 {strides = array<i32>} : memref<120x32xf32, #tpu.memory_space<vmem>>, vector<120x32xf32>,
    %c0_28 = arith.constant 0 : index
    %c0_29 = arith.constant 0 : index
    %31 = vector.load %arg5[%c0_28, %c0_29] : memref<8x32xf32, #tpu.memory_space<vmem>>, vector<8x32xf32>
    %cst_30 = arith.constant 0.000000e+00 : f32
    %32 = vector.broadcast %cst_30 : f32 to vector<8x8xf32>
    %cst_31 = arith.constant 0.000000e+00 : f32
    %33 = vector.broadcast %cst_31 : f32 to vector<8x8xf32>
    %c0_32 = arith.constant 0 : index
    %c0_33 = arith.constant 0 : index
    %34 = vector.load %arg10[%c0_32, %c0_33] : memref<120x32xf32, #tpu.memory_space<vmem>>, vector<8x32xf32>
    %cst_34 = arith.constant dense<0.000000e+00> : vector<8x32xf32>
    %35 = tpu.matmul %32, %31, %cst_34 {dimension_numbers = #tpu.dot_dimension_numbers<[1], [0], [0], [1], [0, 0, 1, 1], [], []>} : vector<8x8xf32>, vector<8x32xf32>, vector<8x32xf32> -> vector<8x32xf32>
    %36 = arith.addf %34, %35 : vector<8x32xf32>
    %37 = arith.negf %36 : vector<8x32xf32>
    %38 = math.exp %37 : vector<8x32xf32>
    %cst_35 = arith.constant 1.000000e+00 : f32
    %39 = vector.broadcast %cst_35 : f32 to vector<8x32xf32>
    %40 = arith.addf %39, %38 : vector<8x32xf32>
    %41 = arith.divf %39, %40 : vector<8x32xf32>
    %42 = math.tanh %36 : vector<8x32xf32>
    %43 = vector.extract_strided_slice %41 {offsets = [0, 8], sizes = [8, 8], strides = [1, 1]} : vector<8x32xf32> to vector<8x8xf32>
    %44 = arith.mulf %43, %33 : vector<8x8xf32>
    %45 = vector.extract_strided_slice %41 {offsets = [0, 0], sizes = [8, 8], strides = [1, 1]} : vector<8x32xf32> to vector<8x8xf32>
    %46 = vector.extract_strided_slice %42 {offsets = [0, 16], sizes = [8, 8], strides = [1, 1]} : vector<8x32xf32> to vector<8x8xf32>
    %47 = arith.mulf %45, %46 : vector<8x8xf32>
    %48 = arith.addf %44, %47 : vector<8x8xf32>
    %49 = vector.extract_strided_slice %41 {offsets = [0, 24], sizes = [8, 8], strides = [1, 1]} : vector<8x32xf32> to vector<8x8xf32>
    %50 = math.tanh %48 : vector<8x8xf32>
    %51 = arith.mulf %49, %50 : vector<8x8xf32>
    %c0_36 = arith.constant 0 : index
    %c0_37 = arith.constant 0 : index
    %52 = vector.load %arg11[%c0_36, %c0_37] : memref<8x120xf32, #tpu.memory_space<vmem>>, vector<8x8xf32>
    tpu.vector_store %arg11[%c0_36, %c0_37], %51 {strides = array<i32>} : memref<8x120xf32, #tpu.memory_space<vmem>>, vector<8x8xf32>,
    %c8 = arith.constant 8 : index
    %c0_38 = arith.constant 0 : index
    %53 = vector.load %arg10[%c8, %c0_38] : memref<120x32xf32, #tpu.memory_space<vmem>>, vector<8x32xf32>
    %cst_39 = arith.constant dense<0.000000e+00> : vector<8x32xf32>
    %54 = tpu.matmul %51, %31, %cst_39 {dimension_numbers = #tpu.dot_dimension_numbers<[1], [0], [0], [1], [0, 0, 1, 1], [], []>} : vector<8x8xf32>, vector<8x32xf32>, vector<8x32xf32> -> vector<8x32xf32>
    %55 = arith.addf %53, %54 : vector<8x32xf32>
    %56 = arith.negf %55 : vector<8x32xf32>
    %57 = math.exp %56 : vector<8x32xf32>
    %cst_40 = arith.constant 1.000000e+00 : f32
    %58 = vector.broadcast %cst_40 : f32 to vector<8x32xf32>
    %59 = arith.addf %58, %57 : vector<8x32xf32>
    %60 = arith.divf %58, %59 : vector<8x32xf32>
    %61 = math.tanh %55 : vector<8x32xf32>
    %62 = vector.extract_strided_slice %60 {offsets = [0, 8], sizes = [8, 8], strides = [1, 1]} : vector<8x32xf32> to vector<8x8xf32>
    %63 = arith.mulf %62, %48 : vector<8x8xf32>
    %64 = vector.extract_strided_slice %60 {offsets = [0, 0], sizes = [8, 8], strides = [1, 1]} : vector<8x32xf32> to vector<8x8xf32>
    %65 = vector.extract_strided_slice %61 {offsets = [0, 16], sizes = [8, 8], strides = [1, 1]} : vector<8x32xf32> to vector<8x8xf32>
    %66 = arith.mulf %64, %65 : vector<8x8xf32>
    %67 = arith.addf %63, %66 : vector<8x8xf32>
    %68 = vector.extract_strided_slice %60 {offsets = [0, 24], sizes = [8, 8], strides = [1, 1]} : vector<8x32xf32> to vector<8x8xf32>
    %69 = math.tanh %67 : vector<8x8xf32>
    %70 = arith.mulf %68, %69 : vector<8x8xf32>
    %c0_41 = arith.constant 0 : index
    %c8_42 = arith.constant 8 : index
    %71 = vector.load %arg11[%c0_41, %c8_42] : memref<8x120xf32, #tpu.memory_space<vmem>>, vector<8x8xf32>
    tpu.vector_store %arg11[%c0_41, %c8_42], %70 {strides = array<i32>} : memref<8x120xf32, #tpu.memory_space<vmem>>, vector<8x8xf32>,
    %c16 = arith.constant 16 : index
    %c0_43 = arith.constant 0 : index
    %72 = vector.load %arg10[%c16, %c0_43] : memref<120x32xf32, #tpu.memory_space<vmem>>, vector<8x32xf32>
    %cst_44 = arith.constant dense<0.000000e+00> : vector<8x32xf32>
    %73 = tpu.matmul %70, %31, %cst_44 {dimension_numbers = #tpu.dot_dimension_numbers<[1], [0], [0], [1], [0, 0, 1, 1], [], []>} : vector<8x8xf32>, vector<8x32xf32>, vector<8x32xf32> -> vector<8x32xf32>
    %74 = arith.addf %72, %73 : vector<8x32xf32>
    %75 = arith.negf %74 : vector<8x32xf32>
    %76 = math.exp %75 : vector<8x32xf32>
    %cst_45 = arith.constant 1.000000e+00 : f32
    %77 = vector.broadcast %cst_45 : f32 to vector<8x32xf32>
    %78 = arith.addf %77, %76 : vector<8x32xf32>
    %79 = arith.divf %77, %78 : vector<8x32xf32>
    %80 = math.tanh %74 : vector<8x32xf32>
    %81 = vector.extract_strided_slice %79 {offsets = [0, 8], sizes = [8, 8], strides = [1, 1]} : vector<8x32xf32> to vector<8x8xf32>
    %82 = arith.mulf %81, %67 : vector<8x8xf32>
    %83 = vector.extract_strided_slice %79 {offsets = [0, 0], sizes = [8, 8], strides = [1, 1]} : vector<8x32xf32> to vector<8x8xf32>
    %84 = vector.extract_strided_slice %80 {offsets = [0, 16], sizes = [8, 8], strides = [1, 1]} : vector<8x32xf32> to vector<8x8xf32>
    %85 = arith.mulf %83, %84 : vector<8x8xf32>
    %86 = arith.addf %82, %85 : vector<8x8xf32>
    %87 = vector.extract_strided_slice %79 {offsets = [0, 24], sizes = [8, 8], strides = [1, 1]} : vector<8x32xf32> to vector<8x8xf32>
    %88 = math.tanh %86 : vector<8x8xf32>
    %89 = arith.mulf %87, %88 : vector<8x8xf32>
    %c0_46 = arith.constant 0 : index
    %c16_47 = arith.constant 16 : index
    %90 = vector.load %arg11[%c0_46, %c16_47] : memref<8x120xf32, #tpu.memory_space<vmem>>, vector<8x8xf32>
    tpu.vector_store %arg11[%c0_46, %c16_47], %89 {strides = array<i32>} : memref<8x120xf32, #tpu.memory_space<vmem>>, vector<8x8xf32>,
    %c24 = arith.constant 24 : index
    %c0_48 = arith.constant 0 : index
    %91 = vector.load %arg10[%c24, %c0_48] : memref<120x32xf32, #tpu.memory_space<vmem>>, vector<8x32xf32>
    %cst_49 = arith.constant dense<0.000000e+00> : vector<8x32xf32>
    %92 = tpu.matmul %89, %31, %cst_49 {dimension_numbers = #tpu.dot_dimension_numbers<[1], [0], [0], [1], [0, 0, 1, 1], [], []>} : vector<8x8xf32>, vector<8x32xf32>, vector<8x32xf32> -> vector<8x32xf32>
    %93 = arith.addf %91, %92 : vector<8x32xf32>
    %94 = arith.negf %93 : vector<8x32xf32>
    %95 = math.exp %94 : vector<8x32xf32>
    %cst_50 = arith.constant 1.000000e+00 : f32
    %96 = vector.broadcast %cst_50 : f32 to vector<8x32xf32>
    %97 = arith.addf %96, %95 : vector<8x32xf32>
    %98 = arith.divf %96, %97 : vector<8x32xf32>
    %99 = math.tanh %93 : vector<8x32xf32>
    %100 = vector.extract_strided_slice %98 {offsets = [0, 8], sizes = [8, 8], strides = [1, 1]} : vector<8x32xf32> to vector<8x8xf32>
    %101 = arith.mulf %100, %86 : vector<8x8xf32>
    %102 = vector.extract_strided_slice %98 {offsets = [0, 0], sizes = [8, 8], strides = [1, 1]} : vector<8x32xf32> to vector<8x8xf32>
    %103 = vector.extract_strided_slice %99 {offsets = [0, 16], sizes = [8, 8], strides = [1, 1]} : vector<8x32xf32> to vector<8x8xf32>
    %104 = arith.mulf %102, %103 : vector<8x8xf32>
    %105 = arith.addf %101, %104 : vector<8x8xf32>
    %106 = vector.extract_strided_slice %98 {offsets = [0, 24], sizes = [8, 8], strides = [1, 1]} : vector<8x32xf32> to vector<8x8xf32>
    %107 = math.tanh %105 : vector<8x8xf32>
    %108 = arith.mulf %106, %107 : vector<8x8xf32>
    %c0_51 = arith.constant 0 : index
    %c24_52 = arith.constant 24 : index
    %109 = vector.load %arg11[%c0_51, %c24_52] : memref<8x120xf32, #tpu.memory_space<vmem>>, vector<8x8xf32>
    tpu.vector_store %arg11[%c0_51, %c24_52], %108 {strides = array<i32>} : memref<8x120xf32, #tpu.memory_space<vmem>>, vector<8x8xf32>,
    %c32 = arith.constant 32 : index
    %c0_53 = arith.constant 0 : index
    %110 = vector.load %arg10[%c32, %c0_53] : memref<120x32xf32, #tpu.memory_space<vmem>>, vector<8x32xf32>
    %cst_54 = arith.constant dense<0.000000e+00> : vector<8x32xf32>
    %111 = tpu.matmul %108, %31, %cst_54 {dimension_numbers = #tpu.dot_dimension_numbers<[1], [0], [0], [1], [0, 0, 1, 1], [], []>} : vector<8x8xf32>, vector<8x32xf32>, vector<8x32xf32> -> vector<8x32xf32>
    %112 = arith.addf %110, %111 : vector<8x32xf32>
    %113 = arith.negf %112 : vector<8x32xf32>
    %114 = math.exp %113 : vector<8x32xf32>
    %cst_55 = arith.constant 1.000000e+00 : f32
    %115 = vector.broadcast %cst_55 : f32 to vector<8x32xf32>
    %116 = arith.addf %115, %114 : vector<8x32xf32>
    %117 = arith.divf %115, %116 : vector<8x32xf32>
    %118 = math.tanh %112 : vector<8x32xf32>
    %119 = vector.extract_strided_slice %117 {offsets = [0, 8], sizes = [8, 8], strides = [1, 1]} : vector<8x32xf32> to vector<8x8xf32>
    %120 = arith.mulf %119, %105 : vector<8x8xf32>
    %121 = vector.extract_strided_slice %117 {offsets = [0, 0], sizes = [8, 8], strides = [1, 1]} : vector<8x32xf32> to vector<8x8xf32>
    %122 = vector.extract_strided_slice %118 {offsets = [0, 16], sizes = [8, 8], strides = [1, 1]} : vector<8x32xf32> to vector<8x8xf32>
    %123 = arith.mulf %121, %122 : vector<8x8xf32>
    %124 = arith.addf %120, %123 : vector<8x8xf32>
    %125 = vector.extract_strided_slice %117 {offsets = [0, 24], sizes = [8, 8], strides = [1, 1]} : vector<8x32xf32> to vector<8x8xf32>
    %126 = math.tanh %124 : vector<8x8xf32>
    %127 = arith.mulf %125, %126 : vector<8x8xf32>
    %c0_56 = arith.constant 0 : index
    %c32_57 = arith.constant 32 : index
    %128 = vector.load %arg11[%c0_56, %c32_57] : memref<8x120xf32, #tpu.memory_space<vmem>>, vector<8x8xf32>
    tpu.vector_store %arg11[%c0_56, %c32_57], %127 {strides = array<i32>} : memref<8x120xf32, #tpu.memory_space<vmem>>, vector<8x8xf32>,
    %c40 = arith.constant 40 : index
    %c0_58 = arith.constant 0 : index
    %129 = vector.load %arg10[%c40, %c0_58] : memref<120x32xf32, #tpu.memory_space<vmem>>, vector<8x32xf32>
    %cst_59 = arith.constant dense<0.000000e+00> : vector<8x32xf32>
    %130 = tpu.matmul %127, %31, %cst_59 {dimension_numbers = #tpu.dot_dimension_numbers<[1], [0], [0], [1], [0, 0, 1, 1], [], []>} : vector<8x8xf32>, vector<8x32xf32>, vector<8x32xf32> -> vector<8x32xf32>
    %131 = arith.addf %129, %130 : vector<8x32xf32>
    %132 = arith.negf %131 : vector<8x32xf32>
    %133 = math.exp %132 : vector<8x32xf32>
    %cst_60 = arith.constant 1.000000e+00 : f32
    %134 = vector.broadcast %cst_60 : f32 to vector<8x32xf32>
    %135 = arith.addf %134, %133 : vector<8x32xf32>
    %136 = arith.divf %134, %135 : vector<8x32xf32>
    %137 = math.tanh %131 : vector<8x32xf32>
    %138 = vector.extract_strided_slice %136 {offsets = [0, 8], sizes = [8, 8], strides = [1, 1]} : vector<8x32xf32> to vector<8x8xf32>
    %139 = arith.mulf %138, %124 : vector<8x8xf32>
    %140 = vector.extract_strided_slice %136 {offsets = [0, 0], sizes = [8, 8], strides = [1, 1]} : vector<8x32xf32> to vector<8x8xf32>
    %141 = vector.extract_strided_slice %137 {offsets = [0, 16], sizes = [8, 8], strides = [1, 1]} : vector<8x32xf32> to vector<8x8xf32>
    %142 = arith.mulf %140, %141 : vector<8x8xf32>
    %143 = arith.addf %139, %142 : vector<8x8xf32>
    %144 = vector.extract_strided_slice %136 {offsets = [0, 24], sizes = [8, 8], strides = [1, 1]} : vector<8x32xf32> to vector<8x8xf32>
    %145 = math.tanh %143 : vector<8x8xf32>
    %146 = arith.mulf %144, %145 : vector<8x8xf32>
    %c0_61 = arith.constant 0 : index
    %c40_62 = arith.constant 40 : index
    %147 = vector.load %arg11[%c0_61, %c40_62] : memref<8x120xf32, #tpu.memory_space<vmem>>, vector<8x8xf32>
    tpu.vector_store %arg11[%c0_61, %c40_62], %146 {strides = array<i32>} : memref<8x120xf32, #tpu.memory_space<vmem>>, vector<8x8xf32>,
    %c48 = arith.constant 48 : index
    %c0_63 = arith.constant 0 : index
    %148 = vector.load %arg10[%c48, %c0_63] : memref<120x32xf32, #tpu.memory_space<vmem>>, vector<8x32xf32>
    %cst_64 = arith.constant dense<0.000000e+00> : vector<8x32xf32>
    %149 = tpu.matmul %146, %31, %cst_64 {dimension_numbers = #tpu.dot_dimension_numbers<[1], [0], [0], [1], [0, 0, 1, 1], [], []>} : vector<8x8xf32>, vector<8x32xf32>, vector<8x32xf32> -> vector<8x32xf32>
    %150 = arith.addf %148, %149 : vector<8x32xf32>
    %151 = arith.negf %150 : vector<8x32xf32>
    %152 = math.exp %151 : vector<8x32xf32>
    %cst_65 = arith.constant 1.000000e+00 : f32
    %153 = vector.broadcast %cst_65 : f32 to vector<8x32xf32>
    %154 = arith.addf %153, %152 : vector<8x32xf32>
    %155 = arith.divf %153, %154 : vector<8x32xf32>
    %156 = math.tanh %150 : vector<8x32xf32>
    %157 = vector.extract_strided_slice %155 {offsets = [0, 8], sizes = [8, 8], strides = [1, 1]} : vector<8x32xf32> to vector<8x8xf32>
    %158 = arith.mulf %157, %143 : vector<8x8xf32>
    %159 = vector.extract_strided_slice %155 {offsets = [0, 0], sizes = [8, 8], strides = [1, 1]} : vector<8x32xf32> to vector<8x8xf32>
    %160 = vector.extract_strided_slice %156 {offsets = [0, 16], sizes = [8, 8], strides = [1, 1]} : vector<8x32xf32> to vector<8x8xf32>
    %161 = arith.mulf %159, %160 : vector<8x8xf32>
    %162 = arith.addf %158, %161 : vector<8x8xf32>
    %163 = vector.extract_strided_slice %155 {offsets = [0, 24], sizes = [8, 8], strides = [1, 1]} : vector<8x32xf32> to vector<8x8xf32>
    %164 = math.tanh %162 : vector<8x8xf32>
    %165 = arith.mulf %163, %164 : vector<8x8xf32>
    %c0_66 = arith.constant 0 : index
    %c48_67 = arith.constant 48 : index
    %166 = vector.load %arg11[%c0_66, %c48_67] : memref<8x120xf32, #tpu.memory_space<vmem>>, vector<8x8xf32>
    tpu.vector_store %arg11[%c0_66, %c48_67], %165 {strides = array<i32>} : memref<8x120xf32, #tpu.memory_space<vmem>>, vector<8x8xf32>,
    %c56 = arith.constant 56 : index
    %c0_68 = arith.constant 0 : index
    %167 = vector.load %arg10[%c56, %c0_68] : memref<120x32xf32, #tpu.memory_space<vmem>>, vector<8x32xf32>
    %cst_69 = arith.constant dense<0.000000e+00> : vector<8x32xf32>
    %168 = tpu.matmul %165, %31, %cst_69 {dimension_numbers = #tpu.dot_dimension_numbers<[1], [0], [0], [1], [0, 0, 1, 1], [], []>} : vector<8x8xf32>, vector<8x32xf32>, vector<8x32xf32> -> vector<8x32xf32>
    %169 = arith.addf %167, %168 : vector<8x32xf32>
    %170 = arith.negf %169 : vector<8x32xf32>
    %171 = math.exp %170 : vector<8x32xf32>
    %cst_70 = arith.constant 1.000000e+00 : f32
    %172 = vector.broadcast %cst_70 : f32 to vector<8x32xf32>
    %173 = arith.addf %172, %171 : vector<8x32xf32>
    %174 = arith.divf %172, %173 : vector<8x32xf32>
    %175 = math.tanh %169 : vector<8x32xf32>
    %176 = vector.extract_strided_slice %174 {offsets = [0, 8], sizes = [8, 8], strides = [1, 1]} : vector<8x32xf32> to vector<8x8xf32>
    %177 = arith.mulf %176, %162 : vector<8x8xf32>
    %178 = vector.extract_strided_slice %174 {offsets = [0, 0], sizes = [8, 8], strides = [1, 1]} : vector<8x32xf32> to vector<8x8xf32>
    %179 = vector.extract_strided_slice %175 {offsets = [0, 16], sizes = [8, 8], strides = [1, 1]} : vector<8x32xf32> to vector<8x8xf32>
    %180 = arith.mulf %178, %179 : vector<8x8xf32>
    %181 = arith.addf %177, %180 : vector<8x8xf32>
    %182 = vector.extract_strided_slice %174 {offsets = [0, 24], sizes = [8, 8], strides = [1, 1]} : vector<8x32xf32> to vector<8x8xf32>
    %183 = math.tanh %181 : vector<8x8xf32>
    %184 = arith.mulf %182, %183 : vector<8x8xf32>
    %c0_71 = arith.constant 0 : index
    %c56_72 = arith.constant 56 : index
    %185 = vector.load %arg11[%c0_71, %c56_72] : memref<8x120xf32, #tpu.memory_space<vmem>>, vector<8x8xf32>
    tpu.vector_store %arg11[%c0_71, %c56_72], %184 {strides = array<i32>} : memref<8x120xf32, #tpu.memory_space<vmem>>, vector<8x8xf32>,
    %c64 = arith.constant 64 : index
    %c0_73 = arith.constant 0 : index
    %186 = vector.load %arg10[%c64, %c0_73] : memref<120x32xf32, #tpu.memory_space<vmem>>, vector<8x32xf32>
    %cst_74 = arith.constant dense<0.000000e+00> : vector<8x32xf32>
    %187 = tpu.matmul %184, %31, %cst_74 {dimension_numbers = #tpu.dot_dimension_numbers<[1], [0], [0], [1], [0, 0, 1, 1], [], []>} : vector<8x8xf32>, vector<8x32xf32>, vector<8x32xf32> -> vector<8x32xf32>
    %188 = arith.addf %186, %187 : vector<8x32xf32>
    %189 = arith.negf %188 : vector<8x32xf32>
    %190 = math.exp %189 : vector<8x32xf32>
    %cst_75 = arith.constant 1.000000e+00 : f32
    %191 = vector.broadcast %cst_75 : f32 to vector<8x32xf32>
    %192 = arith.addf %191, %190 : vector<8x32xf32>
    %193 = arith.divf %191, %192 : vector<8x32xf32>
    %194 = math.tanh %188 : vector<8x32xf32>
    %195 = vector.extract_strided_slice %193 {offsets = [0, 8], sizes = [8, 8], strides = [1, 1]} : vector<8x32xf32> to vector<8x8xf32>
    %196 = arith.mulf %195, %181 : vector<8x8xf32>
    %197 = vector.extract_strided_slice %193 {offsets = [0, 0], sizes = [8, 8], strides = [1, 1]} : vector<8x32xf32> to vector<8x8xf32>
    %198 = vector.extract_strided_slice %194 {offsets = [0, 16], sizes = [8, 8], strides = [1, 1]} : vector<8x32xf32> to vector<8x8xf32>
    %199 = arith.mulf %197, %198 : vector<8x8xf32>
    %200 = arith.addf %196, %199 : vector<8x8xf32>
    %201 = vector.extract_strided_slice %193 {offsets = [0, 24], sizes = [8, 8], strides = [1, 1]} : vector<8x32xf32> to vector<8x8xf32>
    %202 = math.tanh %200 : vector<8x8xf32>
    %203 = arith.mulf %201, %202 : vector<8x8xf32>
    %c0_76 = arith.constant 0 : index
    %c64_77 = arith.constant 64 : index
    %204 = vector.load %arg11[%c0_76, %c64_77] : memref<8x120xf32, #tpu.memory_space<vmem>>, vector<8x8xf32>
    tpu.vector_store %arg11[%c0_76, %c64_77], %203 {strides = array<i32>} : memref<8x120xf32, #tpu.memory_space<vmem>>, vector<8x8xf32>,
    %c72 = arith.constant 72 : index
    %c0_78 = arith.constant 0 : index
    %205 = vector.load %arg10[%c72, %c0_78] : memref<120x32xf32, #tpu.memory_space<vmem>>, vector<8x32xf32>
    %cst_79 = arith.constant dense<0.000000e+00> : vector<8x32xf32>
    %206 = tpu.matmul %203, %31, %cst_79 {dimension_numbers = #tpu.dot_dimension_numbers<[1], [0], [0], [1], [0, 0, 1, 1], [], []>} : vector<8x8xf32>, vector<8x32xf32>, vector<8x32xf32> -> vector<8x32xf32>
    %207 = arith.addf %205, %206 : vector<8x32xf32>
    %208 = arith.negf %207 : vector<8x32xf32>
    %209 = math.exp %208 : vector<8x32xf32>
    %cst_80 = arith.constant 1.000000e+00 : f32
    %210 = vector.broadcast %cst_80 : f32 to vector<8x32xf32>
    %211 = arith.addf %210, %209 : vector<8x32xf32>
    %212 = arith.divf %210, %211 : vector<8x32xf32>
    %213 = math.tanh %207 : vector<8x32xf32>
    %214 = vector.extract_strided_slice %212 {offsets = [0, 8], sizes = [8, 8], strides = [1, 1]} : vector<8x32xf32> to vector<8x8xf32>
    %215 = arith.mulf %214, %200 : vector<8x8xf32>
    %216 = vector.extract_strided_slice %212 {offsets = [0, 0], sizes = [8, 8], strides = [1, 1]} : vector<8x32xf32> to vector<8x8xf32>
    %217 = vector.extract_strided_slice %213 {offsets = [0, 16], sizes = [8, 8], strides = [1, 1]} : vector<8x32xf32> to vector<8x8xf32>
    %218 = arith.mulf %216, %217 : vector<8x8xf32>
    %219 = arith.addf %215, %218 : vector<8x8xf32>
    %220 = vector.extract_strided_slice %212 {offsets = [0, 24], sizes = [8, 8], strides = [1, 1]} : vector<8x32xf32> to vector<8x8xf32>
    %221 = math.tanh %219 : vector<8x8xf32>
    %222 = arith.mulf %220, %221 : vector<8x8xf32>
    %c0_81 = arith.constant 0 : index
    %c72_82 = arith.constant 72 : index
    %223 = vector.load %arg11[%c0_81, %c72_82] : memref<8x120xf32, #tpu.memory_space<vmem>>, vector<8x8xf32>
    tpu.vector_store %arg11[%c0_81, %c72_82], %222 {strides = array<i32>} : memref<8x120xf32, #tpu.memory_space<vmem>>, vector<8x8xf32>,
    %c80 = arith.constant 80 : index
    %c0_83 = arith.constant 0 : index
    %224 = vector.load %arg10[%c80, %c0_83] : memref<120x32xf32, #tpu.memory_space<vmem>>, vector<8x32xf32>
    %cst_84 = arith.constant dense<0.000000e+00> : vector<8x32xf32>
    %225 = tpu.matmul %222, %31, %cst_84 {dimension_numbers = #tpu.dot_dimension_numbers<[1], [0], [0], [1], [0, 0, 1, 1], [], []>} : vector<8x8xf32>, vector<8x32xf32>, vector<8x32xf32> -> vector<8x32xf32>
    %226 = arith.addf %224, %225 : vector<8x32xf32>
    %227 = arith.negf %226 : vector<8x32xf32>
    %228 = math.exp %227 : vector<8x32xf32>
    %cst_85 = arith.constant 1.000000e+00 : f32
    %229 = vector.broadcast %cst_85 : f32 to vector<8x32xf32>
    %230 = arith.addf %229, %228 : vector<8x32xf32>
    %231 = arith.divf %229, %230 : vector<8x32xf32>
    %232 = math.tanh %226 : vector<8x32xf32>
    %233 = vector.extract_strided_slice %231 {offsets = [0, 8], sizes = [8, 8], strides = [1, 1]} : vector<8x32xf32> to vector<8x8xf32>
    %234 = arith.mulf %233, %219 : vector<8x8xf32>
    %235 = vector.extract_strided_slice %231 {offsets = [0, 0], sizes = [8, 8], strides = [1, 1]} : vector<8x32xf32> to vector<8x8xf32>
    %236 = vector.extract_strided_slice %232 {offsets = [0, 16], sizes = [8, 8], strides = [1, 1]} : vector<8x32xf32> to vector<8x8xf32>
    %237 = arith.mulf %235, %236 : vector<8x8xf32>
    %238 = arith.addf %234, %237 : vector<8x8xf32>
    %239 = vector.extract_strided_slice %231 {offsets = [0, 24], sizes = [8, 8], strides = [1, 1]} : vector<8x32xf32> to vector<8x8xf32>
    %240 = math.tanh %238 : vector<8x8xf32>
    %241 = arith.mulf %239, %240 : vector<8x8xf32>
    %c0_86 = arith.constant 0 : index
    %c80_87 = arith.constant 80 : index
    %242 = vector.load %arg11[%c0_86, %c80_87] : memref<8x120xf32, #tpu.memory_space<vmem>>, vector<8x8xf32>
    tpu.vector_store %arg11[%c0_86, %c80_87], %241 {strides = array<i32>} : memref<8x120xf32, #tpu.memory_space<vmem>>, vector<8x8xf32>,
    %c88 = arith.constant 88 : index
    %c0_88 = arith.constant 0 : index
    %243 = vector.load %arg10[%c88, %c0_88] : memref<120x32xf32, #tpu.memory_space<vmem>>, vector<8x32xf32>
    %cst_89 = arith.constant dense<0.000000e+00> : vector<8x32xf32>
    %244 = tpu.matmul %241, %31, %cst_89 {dimension_numbers = #tpu.dot_dimension_numbers<[1], [0], [0], [1], [0, 0, 1, 1], [], []>} : vector<8x8xf32>, vector<8x32xf32>, vector<8x32xf32> -> vector<8x32xf32>
    %245 = arith.addf %243, %244 : vector<8x32xf32>
    %246 = arith.negf %245 : vector<8x32xf32>
    %247 = math.exp %246 : vector<8x32xf32>
    %cst_90 = arith.constant 1.000000e+00 : f32
    %248 = vector.broadcast %cst_90 : f32 to vector<8x32xf32>
    %249 = arith.addf %248, %247 : vector<8x32xf32>
    %250 = arith.divf %248, %249 : vector<8x32xf32>
    %251 = math.tanh %245 : vector<8x32xf32>
    %252 = vector.extract_strided_slice %250 {offsets = [0, 8], sizes = [8, 8], strides = [1, 1]} : vector<8x32xf32> to vector<8x8xf32>
    %253 = arith.mulf %252, %238 : vector<8x8xf32>
    %254 = vector.extract_strided_slice %250 {offsets = [0, 0], sizes = [8, 8], strides = [1, 1]} : vector<8x32xf32> to vector<8x8xf32>
    %255 = vector.extract_strided_slice %251 {offsets = [0, 16], sizes = [8, 8], strides = [1, 1]} : vector<8x32xf32> to vector<8x8xf32>
    %256 = arith.mulf %254, %255 : vector<8x8xf32>
    %257 = arith.addf %253, %256 : vector<8x8xf32>
    %258 = vector.extract_strided_slice %250 {offsets = [0, 24], sizes = [8, 8], strides = [1, 1]} : vector<8x32xf32> to vector<8x8xf32>
    %259 = math.tanh %257 : vector<8x8xf32>
    %260 = arith.mulf %258, %259 : vector<8x8xf32>
    %c0_91 = arith.constant 0 : index
    %c88_92 = arith.constant 88 : index
    %261 = vector.load %arg11[%c0_91, %c88_92] : memref<8x120xf32, #tpu.memory_space<vmem>>, vector<8x8xf32>
    tpu.vector_store %arg11[%c0_91, %c88_92], %260 {strides = array<i32>} : memref<8x120xf32, #tpu.memory_space<vmem>>, vector<8x8xf32>,
    %c96 = arith.constant 96 : index
    %c0_93 = arith.constant 0 : index
    %262 = vector.load %arg10[%c96, %c0_93] : memref<120x32xf32, #tpu.memory_space<vmem>>, vector<8x32xf32>
    %cst_94 = arith.constant dense<0.000000e+00> : vector<8x32xf32>
    %263 = tpu.matmul %260, %31, %cst_94 {dimension_numbers = #tpu.dot_dimension_numbers<[1], [0], [0], [1], [0, 0, 1, 1], [], []>} : vector<8x8xf32>, vector<8x32xf32>, vector<8x32xf32> -> vector<8x32xf32>
    %264 = arith.addf %262, %263 : vector<8x32xf32>
    %265 = arith.negf %264 : vector<8x32xf32>
    %266 = math.exp %265 : vector<8x32xf32>
    %cst_95 = arith.constant 1.000000e+00 : f32
    %267 = vector.broadcast %cst_95 : f32 to vector<8x32xf32>
    %268 = arith.addf %267, %266 : vector<8x32xf32>
    %269 = arith.divf %267, %268 : vector<8x32xf32>
    %270 = math.tanh %264 : vector<8x32xf32>
    %271 = vector.extract_strided_slice %269 {offsets = [0, 8], sizes = [8, 8], strides = [1, 1]} : vector<8x32xf32> to vector<8x8xf32>
    %272 = arith.mulf %271, %257 : vector<8x8xf32>
    %273 = vector.extract_strided_slice %269 {offsets = [0, 0], sizes = [8, 8], strides = [1, 1]} : vector<8x32xf32> to vector<8x8xf32>
    %274 = vector.extract_strided_slice %270 {offsets = [0, 16], sizes = [8, 8], strides = [1, 1]} : vector<8x32xf32> to vector<8x8xf32>
    %275 = arith.mulf %273, %274 : vector<8x8xf32>
    %276 = arith.addf %272, %275 : vector<8x8xf32>
    %277 = vector.extract_strided_slice %269 {offsets = [0, 24], sizes = [8, 8], strides = [1, 1]} : vector<8x32xf32> to vector<8x8xf32>
    %278 = math.tanh %276 : vector<8x8xf32>
    %279 = arith.mulf %277, %278 : vector<8x8xf32>
    %c0_96 = arith.constant 0 : index
    %c96_97 = arith.constant 96 : index
    %280 = vector.load %arg11[%c0_96, %c96_97] : memref<8x120xf32, #tpu.memory_space<vmem>>, vector<8x8xf32>
    tpu.vector_store %arg11[%c0_96, %c96_97], %279 {strides = array<i32>} : memref<8x120xf32, #tpu.memory_space<vmem>>, vector<8x8xf32>,
    %c104 = arith.constant 104 : index
    %c0_98 = arith.constant 0 : index
    %281 = vector.load %arg10[%c104, %c0_98] : memref<120x32xf32, #tpu.memory_space<vmem>>, vector<8x32xf32>
    %cst_99 = arith.constant dense<0.000000e+00> : vector<8x32xf32>
    %282 = tpu.matmul %279, %31, %cst_99 {dimension_numbers = #tpu.dot_dimension_numbers<[1], [0], [0], [1], [0, 0, 1, 1], [], []>} : vector<8x8xf32>, vector<8x32xf32>, vector<8x32xf32> -> vector<8x32xf32>
    %283 = arith.addf %281, %282 : vector<8x32xf32>
    %284 = arith.negf %283 : vector<8x32xf32>
    %285 = math.exp %284 : vector<8x32xf32>
    %cst_100 = arith.constant 1.000000e+00 : f32
    %286 = vector.broadcast %cst_100 : f32 to vector<8x32xf32>
    %287 = arith.addf %286, %285 : vector<8x32xf32>
    %288 = arith.divf %286, %287 : vector<8x32xf32>
    %289 = math.tanh %283 : vector<8x32xf32>
    %290 = vector.extract_strided_slice %288 {offsets = [0, 8], sizes = [8, 8], strides = [1, 1]} : vector<8x32xf32> to vector<8x8xf32>
    %291 = arith.mulf %290, %276 : vector<8x8xf32>
    %292 = vector.extract_strided_slice %288 {offsets = [0, 0], sizes = [8, 8], strides = [1, 1]} : vector<8x32xf32> to vector<8x8xf32>
    %293 = vector.extract_strided_slice %289 {offsets = [0, 16], sizes = [8, 8], strides = [1, 1]} : vector<8x32xf32> to vector<8x8xf32>
    %294 = arith.mulf %292, %293 : vector<8x8xf32>
    %295 = arith.addf %291, %294 : vector<8x8xf32>
    %296 = vector.extract_strided_slice %288 {offsets = [0, 24], sizes = [8, 8], strides = [1, 1]} : vector<8x32xf32> to vector<8x8xf32>
    %297 = math.tanh %295 : vector<8x8xf32>
    %298 = arith.mulf %296, %297 : vector<8x8xf32>
    %c0_101 = arith.constant 0 : index
    %c104_102 = arith.constant 104 : index
    %299 = vector.load %arg11[%c0_101, %c104_102] : memref<8x120xf32, #tpu.memory_space<vmem>>, vector<8x8xf32>
    tpu.vector_store %arg11[%c0_101, %c104_102], %298 {strides = array<i32>} : memref<8x120xf32, #tpu.memory_space<vmem>>, vector<8x8xf32>,
    %c112 = arith.constant 112 : index
    %c0_103 = arith.constant 0 : index
    %300 = vector.load %arg10[%c112, %c0_103] : memref<120x32xf32, #tpu.memory_space<vmem>>, vector<8x32xf32>
    %cst_104 = arith.constant dense<0.000000e+00> : vector<8x32xf32>
    %301 = tpu.matmul %298, %31, %cst_104 {dimension_numbers = #tpu.dot_dimension_numbers<[1], [0], [0], [1], [0, 0, 1, 1], [], []>} : vector<8x8xf32>, vector<8x32xf32>, vector<8x32xf32> -> vector<8x32xf32>
    %302 = arith.addf %300, %301 : vector<8x32xf32>
    %303 = arith.negf %302 : vector<8x32xf32>
    %304 = math.exp %303 : vector<8x32xf32>
    %cst_105 = arith.constant 1.000000e+00 : f32
    %305 = vector.broadcast %cst_105 : f32 to vector<8x32xf32>
    %306 = arith.addf %305, %304 : vector<8x32xf32>
    %307 = arith.divf %305, %306 : vector<8x32xf32>
    %308 = math.tanh %302 : vector<8x32xf32>
    %309 = vector.extract_strided_slice %307 {offsets = [0, 8], sizes = [8, 8], strides = [1, 1]} : vector<8x32xf32> to vector<8x8xf32>
    %310 = arith.mulf %309, %295 : vector<8x8xf32>
    %311 = vector.extract_strided_slice %307 {offsets = [0, 0], sizes = [8, 8], strides = [1, 1]} : vector<8x32xf32> to vector<8x8xf32>
    %312 = vector.extract_strided_slice %308 {offsets = [0, 16], sizes = [8, 8], strides = [1, 1]} : vector<8x32xf32> to vector<8x8xf32>
    %313 = arith.mulf %311, %312 : vector<8x8xf32>
    %314 = arith.addf %310, %313 : vector<8x8xf32>
    %315 = vector.extract_strided_slice %307 {offsets = [0, 24], sizes = [8, 8], strides = [1, 1]} : vector<8x32xf32> to vector<8x8xf32>
    %316 = math.tanh %314 : vector<8x8xf32>
    %317 = arith.mulf %315, %316 : vector<8x8xf32>
    %c0_106 = arith.constant 0 : index
    %c112_107 = arith.constant 112 : index
    %318 = vector.load %arg11[%c0_106, %c112_107] : memref<8x120xf32, #tpu.memory_space<vmem>>, vector<8x8xf32>
    tpu.vector_store %arg11[%c0_106, %c112_107], %317 {strides = array<i32>} : memref<8x120xf32, #tpu.memory_space<vmem>>, vector<8x8xf32>,
    %c0_108 = arith.constant 0 : index
    %c0_109 = arith.constant 0 : index
    %319 = vector.load %arg11[%c0_108, %c0_109] : memref<8x120xf32, #tpu.memory_space<vmem>>, vector<8x120xf32>
    %c0_110 = arith.constant 0 : index
    %c0_111 = arith.constant 0 : index
    %320 = vector.load %arg7[%c0_110, %c0_111] : memref<120x2xf32, #tpu.memory_space<vmem>>, vector<120x2xf32>
    %cst_112 = arith.constant dense<0.000000e+00> : vector<8x2xf32>
    %321 = tpu.matmul %319, %320, %cst_112 {dimension_numbers = #tpu.dot_dimension_numbers<[1], [0], [0], [1], [0, 0, 1, 1], [], []>} : vector<8x120xf32>, vector<120x2xf32>, vector<8x2xf32> -> vector<8x2xf32>
    %c0_113 = arith.constant 0 : index
    %c0_114 = arith.constant 0 : index
    %322 = vector.load %arg8[%c0_113, %c0_114] : memref<1x2xf32, #tpu.memory_space<vmem>>, vector<1x2xf32>
    %323 = vector.broadcast %322 : vector<1x2xf32> to vector<8x2xf32>
    %324 = arith.addf %321, %323 : vector<8x2xf32>
    %c0_115 = arith.constant 0 : index
    %c0_116 = arith.constant 0 : index
    %325 = vector.load %arg9[%c0_115, %c0_116] : memref<8x2xf32, #tpu.memory_space<vmem>>, vector<8x2xf32>
    tpu.vector_store %arg9[%c0_115, %c0_116], %324 {strides = array<i32>} : memref<8x2xf32, #tpu.memory_space<vmem>>, vector<8x2xf32>,
    return
  }
  func.func @transform_0(%arg0: i32) -> (i32, i32, i32) {
    %c0_i32 = arith.constant 0 : i32
    %c0_i32_0 = arith.constant 0 : i32
    %c0_i32_1 = arith.constant 0 : i32
    return %c0_i32, %arg0, %c0_i32_0 : i32, i32, i32
  }
  func.func @transform_1(%arg0: i32) -> (i32, i32, i32) {
    %c0_i32 = arith.constant 0 : i32
    %c0_i32_0 = arith.constant 0 : i32
    %c0_i32_1 = arith.constant 0 : i32
    %c0_i32_2 = arith.constant 0 : i32
    return %c0_i32, %c0_i32_0, %c0_i32_1 : i32, i32, i32
  }
  func.func @transform_2(%arg0: i32) -> (i32, i32) {
    %c0_i32 = arith.constant 0 : i32
    %c0_i32_0 = arith.constant 0 : i32
    %c0_i32_1 = arith.constant 0 : i32
    return %c0_i32, %c0_i32_0 : i32, i32
  }
  func.func @transform_3(%arg0: i32) -> (i32, i32) {
    %c0_i32 = arith.constant 0 : i32
    %c0_i32_0 = arith.constant 0 : i32
    %c0_i32_1 = arith.constant 0 : i32
    return %c0_i32, %c0_i32_0 : i32, i32
  }
  func.func @transform_4(%arg0: i32) -> (i32, i32) {
    %c0_i32 = arith.constant 0 : i32
    %c0_i32_0 = arith.constant 0 : i32
    %c0_i32_1 = arith.constant 0 : i32
    return %c0_i32, %c0_i32_0 : i32, i32
  }
  func.func @transform_5(%arg0: i32) -> (i32, i32) {
    %c0_i32 = arith.constant 0 : i32
    %c0_i32_0 = arith.constant 0 : i32
    %c0_i32_1 = arith.constant 0 : i32
    return %c0_i32, %c0_i32_0 : i32, i32
  }
  func.func @transform_6(%arg0: i32) -> (i32, i32) {
    %c0_i32 = arith.constant 0 : i32
    %c0_i32_0 = arith.constant 0 : i32
    %c0_i32_1 = arith.constant 0 : i32
    return %c0_i32, %c0_i32_0 : i32, i32
  }
  func.func @transform_7(%arg0: i32) -> (i32, i32) {
    %c0_i32 = arith.constant 0 : i32
    %c0_i32_0 = arith.constant 0 : i32
    %c0_i32_1 = arith.constant 0 : i32
    return %c0_i32, %c0_i32_0 : i32, i32
  }
  func.func @transform_8(%arg0: i32) -> (i32, i32) {
    %c0_i32 = arith.constant 0 : i32
    %c0_i32_0 = arith.constant 0 : i32
    return %arg0, %c0_i32 : i32, i32
  }
}

</mosaic_0001>

<bundles_post_ra>
// kernel: tpu_custom_call.1
= control target key start
LH: loop header
LB: loop body
LE: loop exit
PB: predicated region body
PF: predicated region fallthrough
CT: control target
= control target key end

     0   :  { %vm109_vm0 = vcmask 1043456   ;;  %vm63_vm1 = vcmask 31744   ;;  %v1965_v22 = vmov 0.0   ;;  %vm497_vm3 = vcmask 64512   ;;  %s1966_s25 = smov 112   ;;  %s1968_s26 = smov 16   ;;  %s2388_s1 = inlined_call_operand.vmem [shape: f32[3,4,8], index: 1, kind: input, shape index: {}]   ;;  %s2389_s0 = inlined_call_operand.vmem [shape: f32[17,8,4], index: 0, kind: input, shape index: {}]   ;;  %s2390_s3 = inlined_call_operand.vmem [shape: f32[8,32], index: 3, kind: input, shape index: {}]   ;;  %s2391_s4 = inlined_call_operand.vmem [shape: f32[8,32], index: 4, kind: input, shape index: {}]   ;;  %s2392_s2 = inlined_call_operand.vmem [shape: f32[1,8], index: 2, kind: input, shape index: {}]   ;;  %s2393_s5 = inlined_call_operand.vmem [shape: f32[1,32], index: 5, kind: input, shape index: {}]   ;;  %s2394_s7 = inlined_call_operand.vmem [shape: f32[1,2], index: 7, kind: input, shape index: {}]   ;;  %s2395_s6 = inlined_call_operand.vmem [shape: f32[120,2], index: 6, kind: input, shape index: {}]   ;;  %s2396_s8 = inlined_call_operand.vmem [shape: f32[8,2], index: 8, kind: output, shape index: {}]  }
   0x1   :  { %v1763_v0 = vld [vmem:[%s2388_s1 + $0x8] sm:$0xf]  ;;  %v1748_v1 = vld [vmem:[%s2389_s0 + $0x10] sm:$0xff]  ;;  %v1715_v2 = vld [vmem:[%s2388_s1 + $0x4] sm:$0xf]  ;;  %s1969_s27 = smov 104  }
   0x2   :  { %1764 = vmatpush.msk.msra.mxu2 %vm109_vm0, %v1763_v0  ;;  %1716 = vmatpush.msk.msra.mxu0 %vm109_vm0, %v1715_v2  ;;  %v44_v3 = vld [vmem:[%s2388_s1] sm:$0xf]  ;;  %v1700_v4 = vld [vmem:[%s2389_s0 + $0x8] sm:$0xff]  ;;  %v1749_v8 = vld [vmem:[%s2389_s0 + $0x18] sm:$0xff]  ;;  %s1971_s30 = smov 64   ;;  %s1972_s9 = smov 120  }
   0x3   :  { %v29_v5 = vld [vmem:[%s2389_s0] sm:$0xff]  ;;  %1765 = vmatmul.msk.f32.vlgmr.msra.gmra.mxu2 %vm63_vm1, %v1748_v1  ;;  %1732 = vmatpush.msk.msra.mxu1 %vm109_vm0, %v44_v3  ;;  %v1751_v10 = vld [vmem:[%s2389_s0 + $0x28] sm:$0xff]  ;;  %v1752_v11 = vld [vmem:[%s2389_s0 + $0x30] sm:$0xff]  ;;  %s1973_s10 = smov 24   ;;  %s1974_s11 = smov 48  }
   0x4   :  { %v492_v6 = vld [vmem:[%s2390_s3] sm:$0xff]  ;;  %1717 = vmatmul.msk.f32.vlgmr.msra.gmra.mxu0 %vm63_vm1, %v1700_v4  ;;  %1733 = vmatmul.msk.f32.vlgmr.msra.gmra.mxu1 %vm63_vm1, %v29_v5  ;;  %v1753_v12 = vld [vmem:[%s2389_s0 + $0x38] sm:$0xff]  ;;  %v1755_v14 = vld [vmem:[%s2389_s0 + $0x48] sm:$0xff]  ;;  %s1975_s12 = smov 72   ;;  %s1976_s13 = smov 32  }
   0x5   :  { %v2052_v7 = vld [vmem:[%s2391_s4] sm:$0xff]  ;;  %558 = vmatpush.msrb.mxu1 %v492_v6  ;;  %1825 = vmatpush.msra.mxu3 %v492_v6  ;;  %v1756_v15 = vld [vmem:[%s2389_s0 + $0x50] sm:$0xff]  ;;  %v1757_v16 = vld [vmem:[%s2389_s0 + $0x58] sm:$0xff]  ;;  %s1977_s14 = smov 56   ;;  %s1978_s15 = smov 80  }
   0x6   :  { %641 = vmatpush.msrb.mxu0 %v2052_v7  ;;  %776 = vmatpush.msrb.mxu2 %v2052_v7  ;;  %v1750_v9 = vld [vmem:[%s2389_s0 + $0x20] sm:$0xff]  ;;  %v1759_v18 = vld [vmem:[%s2389_s0 + $0x68] sm:$0xff]  ;;  %v1760_v19 = vld [vmem:[%s2389_s0 + $0x70] sm:$0xff]  ;;  %s1979_s19 = smov 88  }
   0x7   :  { %707 = vmatpush.msra.mxu1 %v2052_v7  ;;  %1118 = vmatpush.msrb.mxu3 %v2052_v7  ;;  %v1754_v13 = vld [vmem:[%s2389_s0 + $0x40] sm:$0xff]  ;;  %v1761_v20 = vld [vmem:[%s2389_s0 + $0x78] sm:$0xff] }
   0x8   :  { %845 = vmatpush.msra.mxu0 %v2052_v7  ;;  %1049 = vmatpush.msra.mxu2 %v2052_v7  ;;  %v1758_v17 = vld [vmem:[%s2389_s0 + $0x60] sm:$0xff] }
   0x9   :  { %v1762_v21 = vld [vmem:[%s2389_s0 + $0x80] sm:$0xff] }
   0xa   :  { %v2148_v26 = vld [vmem:[%s2392_s2] ss:$0 sm:$0xff] }
   0xb   :  { %1766 = vmatmul.msk.f32.gmra.mxu2 %vm63_vm1, %v1749_v8 }
   0xc   :  { %1718 = vmatmul.msk.f32.gmra.mxu0 %vm63_vm1, %v1748_v1  ;;  %1734 = vmatmul.msk.f32.gmra.mxu1 %vm63_vm1, %v1700_v4 }
  0x13   :  { %1767 = vmatmul.msk.f32.gmra.mxu2 %vm63_vm1, %v1750_v9 }
  0x14   :  { %1719 = vmatmul.msk.f32.gmra.mxu0 %vm63_vm1, %v1749_v8  ;;  %1735 = vmatmul.msk.f32.gmra.mxu1 %vm63_vm1, %v1748_v1 }
  0x1b   :  { %1768 = vmatmul.msk.f32.gmra.mxu2 %vm63_vm1, %v1751_v10 }
  0x1c   :  { %1720 = vmatmul.msk.f32.gmra.mxu0 %vm63_vm1, %v1750_v9  ;;  %1736 = vmatmul.msk.f32.gmra.mxu1 %vm63_vm1, %v1749_v8 }
  0x23   :  { %1769 = vmatmul.msk.f32.gmra.mxu2 %vm63_vm1, %v1752_v11 }
  0x24   :  { %1721 = vmatmul.msk.f32.gmra.mxu0 %vm63_vm1, %v1751_v10  ;;  %1737 = vmatmul.msk.f32.gmra.mxu1 %vm63_vm1, %v1750_v9 }
  0x2b   :  { %1770 = vmatmul.msk.f32.gmra.mxu2 %vm63_vm1, %v1753_v12 }
  0x2c   :  { %1722 = vmatmul.msk.f32.gmra.mxu0 %vm63_vm1, %v1752_v11  ;;  %1738 = vmatmul.msk.f32.gmra.mxu1 %vm63_vm1, %v1751_v10 }
  0x33   :  { %1771 = vmatmul.msk.f32.gmra.mxu2 %vm63_vm1, %v1754_v13 }
  0x34   :  { %1723 = vmatmul.msk.f32.gmra.mxu0 %vm63_vm1, %v1753_v12  ;;  %1739 = vmatmul.msk.f32.gmra.mxu1 %vm63_vm1, %v1752_v11 }
  0x3b   :  { %1772 = vmatmul.msk.f32.gmra.mxu2 %vm63_vm1, %v1755_v14 }
  0x3c   :  { %1724 = vmatmul.msk.f32.gmra.mxu0 %vm63_vm1, %v1754_v13  ;;  %1740 = vmatmul.msk.f32.gmra.mxu1 %vm63_vm1, %v1753_v12 }
  0x43   :  { %1773 = vmatmul.msk.f32.gmra.mxu2 %vm63_vm1, %v1756_v15 }
  0x44   :  { %1725 = vmatmul.msk.f32.gmra.mxu0 %vm63_vm1, %v1755_v14  ;;  %1741 = vmatmul.msk.f32.gmra.mxu1 %vm63_vm1, %v1754_v13 }
  0x4b   :  { %1774 = vmatmul.msk.f32.gmra.mxu2 %vm63_vm1, %v1757_v16 }
  0x4c   :  { %1726 = vmatmul.msk.f32.gmra.mxu0 %vm63_vm1, %v1756_v15  ;;  %1742 = vmatmul.msk.f32.gmra.mxu1 %vm63_vm1, %v1755_v14 }
  0x53   :  { %1775 = vmatmul.msk.f32.gmra.mxu2 %vm63_vm1, %v1758_v17 }
  0x54   :  { %1727 = vmatmul.msk.f32.gmra.mxu0 %vm63_vm1, %v1757_v16  ;;  %1743 = vmatmul.msk.f32.gmra.mxu1 %vm63_vm1, %v1756_v15 }
  0x5b   :  { %1776 = vmatmul.msk.f32.gmra.mxu2 %vm63_vm1, %v1759_v18 }
  0x5c   :  { %1728 = vmatmul.msk.f32.gmra.mxu0 %vm63_vm1, %v1758_v17  ;;  %1744 = vmatmul.msk.f32.gmra.mxu1 %vm63_vm1, %v1757_v16 }
  0x63   :  { %1777 = vmatmul.msk.f32.gmra.mxu2 %vm63_vm1, %v1760_v19 }
  0x64   :  { %1729 = vmatmul.msk.f32.gmra.mxu0 %vm63_vm1, %v1759_v18  ;;  %1745 = vmatmul.msk.f32.gmra.mxu1 %vm63_vm1, %v1758_v17 }
  0x6b   :  { %1778 = vmatmul.msk.f32.gmra.mxu2 %vm63_vm1, %v1761_v20 }
  0x6c   :  { %1730 = vmatmul.msk.f32.gmra.mxu0 %vm63_vm1, %v1760_v19  ;;  %1746 = vmatmul.msk.f32.gmra.mxu1 %vm63_vm1, %v1759_v18 }
  0x73   :  { %1779 = vmatmul.msk.f32.gmra.mxu2 %vm63_vm1, %v1762_v21 }
  0x74   :  { %1731 = vmatmul.msk.f32.gmra.mxu0 %vm63_vm1, %v1761_v20  ;;  %1747 = vmatmul.msk.f32.gmra.mxu1 %vm63_vm1, %v1760_v19 }
  0x7c   :  { %642 = vmatmul.f32.vlgmr.msrb.gmra.mxu0 %v1965_v22 }
  0x7d   :  { %911 = vmatpush.msrb.mxu0 %v2052_v7 }
  0x81   :  { %v130_v23 = vpop.f32.mrf.mxu0  ;;  %v240_v24 = vpop.f32.mrf.mxu1 }
  0x82   :  { %v241_v25 = vadd.f32 %v240_v24, %v130_v23 }
  0x86   :  { %v368_v27 = vpop.f32.mrf.mxu2 }
  0x87   :  { %v413_v28 = vadd.f32 %v368_v27, %v241_v25 }
  0x89   :  { %v432_v29 = vadd.f32 %v2148_v26, %v413_v28  ;;  %v133_v30 = vpop.f32.mrf.mxu0  ;;  %v243_v31 = vpop.f32.mrf.mxu1 }
  0x8a   :  { %v244_v33 = vadd.f32 %v243_v31, %v133_v30 }
  0x8b   :  { %v462_v32 = vmul.f32 0.01, %v432_v29  ;;  %vm447_vm2 = vcmp.ge.f32.partialorder %v432_v29, 0.0 }
  0x8d   :  { %v477_v34 = vsel %vm447_vm2, %v432_v29, %v462_v32  ;;  %vm605_vm2 = vcmask 261120  }
  0x8e   :  { %1780 = vmatmul.msk.f32.vlgmr.msrb.gmra.mxu1 %vm497_vm3, %v477_v34  ;;  %v371_v35 = vpop.f32.mrf.mxu2 }
  0x8f   :  { %v414_v36 = vadd.f32 %v371_v35, %v244_v33  ;;  %980 = vmatpush.msrb.mxu1 %v2052_v7 }
  0x91   :  { %v433_v37 = vadd.f32 %v2148_v26, %v414_v36  ;;  %v136_v38 = vpop.f32.mrf.mxu0  ;;  %v246_v39 = vpop.f32.mrf.mxu1 }
  0x92   :  { %v247_v40 = vadd.f32 %v246_v39, %v136_v38 }
  0x93   :  { %vm448_vm4 = vcmp.ge.f32.partialorder %v433_v37, 0.0  ;;  %v463_v41 = vmul.f32 0.01, %v433_v37 }
  0x95   :  { %v478_v42 = vsel %vm448_vm4, %v433_v37, %v463_v41 }
  0x96   :  { %v374_v43 = vpop.f32.mrf.mxu2  ;;  %1781 = vmatmul.msk.f32.vlgmr.msra.gmra.mxu3 %vm497_vm3, %v478_v42 }
  0x97   :  { %v415_v44 = vadd.f32 %v374_v43, %v247_v40  ;;  %1394 = vmatpush.msra.mxu3 %v2052_v7 }
  0x99   :  { %v434_v45 = vadd.f32 %v2148_v26, %v415_v44  ;;  %v139_v46 = vpop.f32.mrf.mxu0  ;;  %v249_v47 = vpop.f32.mrf.mxu1 }
  0x9a   :  { %v250_v48 = vadd.f32 %v249_v47, %v139_v46 }
  0x9b   :  { %vm449_vm5 = vcmp.ge.f32.partialorder %v434_v45, 0.0  ;;  %v464_v49 = vmul.f32 0.01, %v434_v45 }
  0x9d   :  { %v479_v50 = vsel %vm449_vm5, %v434_v45, %v464_v49 }
  0x9e   :  { %v377_v51 = vpop.f32.mrf.mxu2  ;;  %1782 = vmatmul.msk.f32.gmra.mxu3 %vm497_vm3, %v479_v50 }
  0x9f   :  { %v416_v52 = vadd.f32 %v377_v51, %v250_v48 }
  0xa1   :  { %v435_v53 = vadd.f32 %v2148_v26, %v416_v52  ;;  %v142_v54 = vpop.f32.mrf.mxu0  ;;  %v252_v55 = vpop.f32.mrf.mxu1 }
  0xa2   :  { %v253_v56 = vadd.f32 %v252_v55, %v142_v54 }
  0xa3   :  { %vm450_vm6 = vcmp.ge.f32.partialorder %v435_v53, 0.0  ;;  %v465_v57 = vmul.f32 0.01, %v435_v53 }
  0xa5   :  { %v480_v58 = vsel %vm450_vm6, %v435_v53, %v465_v57 }
  0xa6   :  { %v380_v59 = vpop.f32.mrf.mxu2  ;;  %1783 = vmatmul.msk.f32.gmra.mxu3 %vm497_vm3, %v480_v58 }
  0xa7   :  { %v417_v60 = vadd.f32 %v380_v59, %v253_v56 }
  0xa9   :  { %v436_v61 = vadd.f32 %v2148_v26, %v417_v60  ;;  %v145_v62 = vpop.f32.mrf.mxu0  ;;  %v255_v63 = vpop.f32.mrf.mxu1 }
  0xaa   :  { %v256_v0 = vadd.f32 %v255_v63, %v145_v62 }
  0xab   :  { %vm451_vm7 = vcmp.ge.f32.partialorder %v436_v61, 0.0  ;;  %v466_v1 = vmul.f32 0.01, %v436_v61 }
  0xad   :  { %v481_v2 = vsel %vm451_vm7, %v436_v61, %v466_v1 }
  0xae   :  { %v383_v3 = vpop.f32.mrf.mxu2  ;;  %1784 = vmatmul.msk.f32.gmra.mxu3 %vm497_vm3, %v481_v2 }
  0xaf   :  { %v418_v4 = vadd.f32 %v383_v3, %v256_v0 }
  0xb1   :  { %v437_v5 = vadd.f32 %v2148_v26, %v418_v4  ;;  %v148_v6 = vpop.f32.mrf.mxu0  ;;  %v258_v8 = vpop.f32.mrf.mxu1 }
  0xb2   :  { %v259_v9 = vadd.f32 %v258_v8, %v148_v6 }
  0xb3   :  { %vm452_vm8 = vcmp.ge.f32.partialorder %v437_v5, 0.0  ;;  %v467_v10 = vmul.f32 0.01, %v437_v5 }
  0xb5   :  { %v482_v11 = vsel %vm452_vm8, %v437_v5, %v467_v10 }
  0xb6   :  { %v386_v12 = vpop.f32.mrf.mxu2  ;;  %1785 = vmatmul.msk.f32.gmra.mxu3 %vm497_vm3, %v482_v11 }
  0xb7   :  { %v419_v13 = vadd.f32 %v386_v12, %v259_v9 }
  0xb9   :  { %v438_v14 = vadd.f32 %v2148_v26, %v419_v13  ;;  %v151_v15 = vpop.f32.mrf.mxu0  ;;  %v261_v16 = vpop.f32.mrf.mxu1 }
  0xba   :  { %v262_v17 = vadd.f32 %v261_v16, %v151_v15 }
  0xbb   :  { %vm453_vm9 = vcmp.ge.f32.partialorder %v438_v14, 0.0  ;;  %v468_v18 = vmul.f32 0.01, %v438_v14 }
  0xbd   :  { %v483_v19 = vsel %vm453_vm9, %v438_v14, %v468_v18 }
  0xbe   :  { %v389_v20 = vpop.f32.mrf.mxu2  ;;  %1786 = vmatmul.msk.f32.gmra.mxu3 %vm497_vm3, %v483_v19  ;;  %v1842_v19 = vld [vmem:[%s2393_s5] ss:$0 sm:$0xff]  ;;  %s1967_s5 = smov 8  }
  0xbf   :  { %v420_v21 = vadd.f32 %v389_v20, %v262_v17 }
  0xc1   :  { %v439_v22 = vadd.f32 %v2148_v26, %v420_v21  ;;  %v154_v23 = vpop.f32.mrf.mxu0  ;;  %v264_v24 = vpop.f32.mrf.mxu1 }
  0xc2   :  { %v265_v25 = vadd.f32 %v264_v24, %v154_v23 }
  0xc3   :  { %vm454_vm10 = vcmp.ge.f32.partialorder %v439_v22, 0.0  ;;  %v469_v27 = vmul.f32 0.01, %v439_v22 }
  0xc5   :  { %v484_v28 = vsel %vm454_vm10, %v439_v22, %v469_v27 }
  0xc6   :  { %v392_v29 = vpop.f32.mrf.mxu2  ;;  %1787 = vmatmul.msk.f32.gmra.mxu3 %vm497_vm3, %v484_v28 }
  0xc7   :  { %v421_v30 = vadd.f32 %v392_v29, %v265_v25 }
  0xc9   :  { %v440_v31 = vadd.f32 %v2148_v26, %v421_v30  ;;  %v157_v32 = vpop.f32.mrf.mxu0  ;;  %v267_v33 = vpop.f32.mrf.mxu1 }
  0xca   :  { %v268_v34 = vadd.f32 %v267_v33, %v157_v32 }
  0xcb   :  { %vm455_vm11 = vcmp.ge.f32.partialorder %v440_v31, 0.0  ;;  %v470_v35 = vmul.f32 0.01, %v440_v31 }
  0xcd   :  { %v485_v36 = vsel %vm455_vm11, %v440_v31, %v470_v35 }
  0xce   :  { %v395_v37 = vpop.f32.mrf.mxu2  ;;  %1788 = vmatmul.msk.f32.gmra.mxu3 %vm497_vm3, %v485_v36 }
  0xcf   :  { %v422_v38 = vadd.f32 %v395_v37, %v268_v34 }
  0xd1   :  { %v441_v39 = vadd.f32 %v2148_v26, %v422_v38  ;;  %v160_v40 = vpop.f32.mrf.mxu0  ;;  %v270_v41 = vpop.f32.mrf.mxu1 }
  0xd2   :  { %v271_v42 = vadd.f32 %v270_v41, %v160_v40 }
  0xd3   :  { %vm456_vm12 = vcmp.ge.f32.partialorder %v441_v39, 0.0  ;;  %v471_v43 = vmul.f32 0.01, %v441_v39 }
  0xd5   :  { %v486_v44 = vsel %vm456_vm12, %v441_v39, %v471_v43 }
  0xd6   :  { %v398_v45 = vpop.f32.mrf.mxu2  ;;  %1789 = vmatmul.msk.f32.gmra.mxu3 %vm497_vm3, %v486_v44 }
  0xd7   :  { %v423_v46 = vadd.f32 %v398_v45, %v271_v42 }
  0xd9   :  { %v442_v47 = vadd.f32 %v2148_v26, %v423_v46  ;;  %v163_v48 = vpop.f32.mrf.mxu0  ;;  %v273_v49 = vpop.f32.mrf.mxu1 }
  0xda   :  { %v274_v50 = vadd.f32 %v273_v49, %v163_v48 }
  0xdb   :  { %vm457_vm13 = vcmp.ge.f32.partialorder %v442_v47, 0.0  ;;  %v472_v51 = vmul.f32 0.01, %v442_v47 }
  0xdd   :  { %v487_v52 = vsel %vm457_vm13, %v442_v47, %v472_v51 }
  0xde   :  { %v401_v53 = vpop.f32.mrf.mxu2  ;;  %1790 = vmatmul.msk.f32.gmra.mxu3 %vm497_vm3, %v487_v52 }
  0xdf   :  { %v424_v54 = vadd.f32 %v401_v53, %v274_v50 }
  0xe1   :  { %v443_v55 = vadd.f32 %v2148_v26, %v424_v54  ;;  %v166_v56 = vpop.f32.mrf.mxu0  ;;  %v276_v57 = vpop.f32.mrf.mxu1 }
  0xe2   :  { %v277_v58 = vadd.f32 %v276_v57, %v166_v56 }
  0xe3   :  { %vm458_vm14 = vcmp.ge.f32.partialorder %v443_v55, 0.0  ;;  %v473_v59 = vmul.f32 0.01, %v443_v55 }
  0xe5   :  { %v488_v60 = vsel %vm458_vm14, %v443_v55, %v473_v59 }
  0xe6   :  { %v404_v61 = vpop.f32.mrf.mxu2  ;;  %1791 = vmatmul.msk.f32.gmra.mxu3 %vm497_vm3, %v488_v60 }
  0xe7   :  { %v425_v62 = vadd.f32 %v404_v61, %v277_v58 }
  0xe9   :  { %v444_v63 = vadd.f32 %v2148_v26, %v425_v62  ;;  %v169_v0 = vpop.f32.mrf.mxu0  ;;  %v279_v1 = vpop.f32.mrf.mxu1 }
  0xea   :  { %v280_v2 = vadd.f32 %v279_v1, %v169_v0 }
  0xeb   :  { %vm459_vm15 = vcmp.ge.f32.partialorder %v444_v63, 0.0  ;;  %v474_v3 = vmul.f32 0.01, %v444_v63 }
  0xed   :  { %v489_v4 = vsel %vm459_vm15, %v444_v63, %v474_v3 }
  0xee   :  { %v407_v5 = vpop.f32.mrf.mxu2  ;;  %1792 = vmatmul.msk.f32.gmra.mxu3 %vm497_vm3, %v489_v4 }
  0xef   :  { %v426_v6 = vadd.f32 %v407_v5, %v280_v2 }
  0xf1   :  { %v445_v8 = vadd.f32 %v2148_v26, %v426_v6  ;;  %v172_v9 = vpop.f32.mrf.mxu0  ;;  %v282_v10 = vpop.f32.mrf.mxu1 }
  0xf2   :  { %v283_v11 = vadd.f32 %v282_v10, %v172_v9 }
  0xf3   :  { %vm460_vm0 = vcmp.ge.f32.partialorder %v445_v8, 0.0  ;;  %v475_v12 = vmul.f32 0.01, %v445_v8 }
  0xf5   :  { %v490_v13 = vsel %vm460_vm0, %v445_v8, %v475_v12 }
  0xf6   :  { %v410_v14 = vpop.f32.mrf.mxu2  ;;  %1793 = vmatmul.msk.f32.gmra.mxu3 %vm497_vm3, %v490_v13 }
  0xf7   :  { %v427_v15 = vadd.f32 %v410_v14, %v283_v11 }
  0xf9   :  { %v446_v16 = vadd.f32 %v2148_v26, %v427_v15  ;;  %v643_v22 = vpop.f32.mrf.mxu0 }
  0xfb   :  { %vm461_vm1 = vcmp.ge.f32.partialorder %v446_v16, 0.0  ;;  %v476_v17 = vmul.f32 0.01, %v446_v16 }
  0xfd   :  { %v491_v18 = vsel %vm461_vm1, %v446_v16, %v476_v17 }
  0xfe   :  { %1794 = vmatmul.msk.f32.gmra.mxu3 %vm497_vm3, %v491_v18 }
 0x10b   :  { %v560_v20 = vpop.f32.mrf.mxu1 }
 0x10c   :  { %v561_v21 = vadd.f32 %v1842_v19, %v560_v20 }
 0x10e   :  { %606 = vst.msk [vmem:[#allocation2] sm:$0xff] %vm605_vm2, %v561_v21 }
 0x115   :  { %v622_v23 = vld [vmem:[#allocation2] sm:$0xff] }
 0x116   :  { %v646_v24 = vadd.f32 %v643_v22, %v622_v23 }
 0x118   :  { %1844 = vtanh.f32 %v646_v24  ;;  %v1795_v46 = vmul.f32 -1.442695, %v646_v24 }
 0x119   :  { %v563_v25 = vpop.f32.mrf.mxu3 }
 0x11a   :  { %v564_v26 = vadd.f32 %v1842_v19, %v563_v25  ;;  %1846 = vpow2.f32 %v1795_v46 }
 0x11c   :  { %607 = vst.msk [vmem:[#allocation2 + $0x8] sm:$0xff] %vm605_vm2, %v564_v26 }
 0x11e   :  { %v1845_v27 = vpop.eup %1844 }
 0x11f   :  { %669 = vrot.lane.b32.xlu0 %v1845_v27, %s1966_s25 }
 0x120   :  { %v1847_v49 = vpop.eup %1846 }
 0x121   :  { %v566_v28 = vpop.f32.mrf.mxu3  ;;  %v650_v50 = vadd.f32 1.0, %v1847_v49 }
 0x122   :  { %v567_v29 = vadd.f32 %v1842_v19, %v566_v28 }
 0x123   :  { %1848 = vrcp.f32 %v650_v50  ;;  %v662_v62 = vand.u32 2147483648, %v650_v50  ;;  %vm656_vm5 = vweird.f32 %v650_v50  ;;  %v660_v63 = vand.u32 2147483647, %v650_v50  ;;  %v689_v13 = vld [vmem:[#allocation2 + $0x8] sm:$0xff] }
 0x124   :  { %608 = vst.msk [vmem:[#allocation2 + $0x10] sm:$0xff] %vm605_vm2, %v567_v29 }
 0x125   :  { %v663_v1 = vor.u32 1.1754944e-38, %v662_v62  ;;  %vm661_vm7 = vcmp.eq.f32.partialorder %v660_v63, 8.507059e+37 }
 0x129   :  { %v569_v30 = vpop.f32.mrf.mxu3  ;;  %v1849_v55 = vpop.eup %1848 }
 0x12a   :  { %v570_v31 = vadd.f32 %v1842_v19, %v569_v30  ;;  %v652_v56 = vmul.f32 %v1849_v55, %v650_v50  ;;  %vm657_vm4 = vweird.f32 %v1849_v55 }
 0x12b   :  { %vm658_vm6 = vmor %vm656_vm5, %vm657_vm4 }
 0x12c   :  { %609 = vst.msk [vmem:[#allocation2 + $0x18] sm:$0xff] %vm605_vm2, %v570_v31  ;;  %v653_v59 = vsub.f32 1.0, %v652_v56 }
 0x12e   :  { %v654_v60 = vmul.f32 %v1849_v55, %v653_v59 }
 0x130   :  { %v655_v61 = vadd.f32 %v1849_v55, %v654_v60 }
 0x131   :  { %v572_v32 = vpop.f32.mrf.mxu3 }
 0x132   :  { %v573_v33 = vadd.f32 %v1842_v19, %v572_v32  ;;  %v659_v0 = vsel %vm658_vm6, %v1849_v55, %v655_v61 }
 0x133   :  { %v664_v3 = vsel %vm661_vm7, %v663_v1, %v659_v0  ;;  %v825_v1 = vld [vmem:[#allocation2 + $0x18] sm:$0xff] }
 0x134   :  { %610 = vst.msk [vmem:[#allocation2 + $0x20] sm:$0xff] %vm605_vm2, %v573_v33  ;;  %v667_v5 = vmul.f32 0.0, %v664_v3 }
 0x139   :  { %v575_v34 = vpop.f32.mrf.mxu3 }
 0x13a   :  { %v576_v35 = vadd.f32 %v1842_v19, %v575_v34 }
 0x13c   :  { %611 = vst.msk [vmem:[#allocation2 + $0x28] sm:$0xff] %vm605_vm2, %v576_v35 }
 0x141   :  { %v578_v36 = vpop.f32.mrf.mxu3 }
 0x142   :  { %v579_v37 = vadd.f32 %v1842_v19, %v578_v36 }
 0x144   :  { %612 = vst.msk [vmem:[#allocation2 + $0x30] sm:$0xff] %vm605_vm2, %v579_v37 }
 0x149   :  { %v581_v38 = vpop.f32.mrf.mxu3 }
 0x14a   :  { %v582_v39 = vadd.f32 %v1842_v19, %v581_v38 }
 0x14c   :  { %613 = vst.msk [vmem:[#allocation2 + $0x38] sm:$0xff] %vm605_vm2, %v582_v39  ;;  %v756_v39 = vld [vmem:[#allocation2 + $0x10] sm:$0xff] }
 0x151   :  { %v584_v40 = vpop.f32.mrf.mxu3 }
 0x152   :  { %v585_v41 = vadd.f32 %v1842_v19, %v584_v40 }
 0x154   :  { %614 = vst.msk [vmem:[#allocation2 + $0x40] sm:$0xff] %vm605_vm2, %v585_v41 }
 0x159   :  { %v587_v42 = vpop.f32.mrf.mxu3 }
 0x15a   :  { %v588_v43 = vadd.f32 %v1842_v19, %v587_v42 }
 0x15c   :  { %615 = vst.msk [vmem:[#allocation2 + $0x48] sm:$0xff] %vm605_vm2, %v588_v43 }
 0x161   :  { %v590_v44 = vpop.f32.mrf.mxu3 }
 0x162   :  { %v591_v45 = vadd.f32 %v1842_v19, %v590_v44 }
 0x164   :  { %616 = vst.msk [vmem:[#allocation2 + $0x50] sm:$0xff] %vm605_vm2, %v591_v45 }
 0x169   :  { %v593_v47 = vpop.f32.mrf.mxu3 }
 0x16a   :  { %v594_v48 = vadd.f32 %v1842_v19, %v593_v47 }
 0x16c   :  { %617 = vst.msk [vmem:[#allocation2 + $0x58] sm:$0xff] %vm605_vm2, %v594_v48 }
 0x171   :  { %v596_v51 = vpop.f32.mrf.mxu3 }
 0x172   :  { %v597_v52 = vadd.f32 %v1842_v19, %v596_v51 }
 0x174   :  { %618 = vst.msk [vmem:[#allocation2 + $0x60] sm:$0xff] %vm605_vm2, %v597_v52 }
 0x179   :  { %v599_v53 = vpop.f32.mrf.mxu3 }
 0x17a   :  { %v600_v54 = vadd.f32 %v1842_v19, %v599_v53 }
 0x17c   :  { %619 = vst.msk [vmem:[#allocation2 + $0x68] sm:$0xff] %vm605_vm2, %v600_v54 }
 0x181   :  { %v602_v57 = vpop.f32.mrf.mxu3 }
 0x182   :  { %v603_v58 = vadd.f32 %v1842_v19, %v602_v57 }
 0x184   :  { %620 = vst.msk [vmem:[#allocation2 + $0x70] sm:$0xff] %vm605_vm2, %v603_v58 }
 0x191   :  { %v670_v2 = vpop.permute.xlu0 %669 }
 0x192   :  { %v672_v4 = vmul.f32 %v670_v2, %v664_v3 }
 0x194   :  { %674 = vrot.lane.b32.xlu0 %v672_v4, %s1967_s5 }
 0x206   :  { %v675_v6 = vpop.permute.xlu0 %674 }
 0x207   :  { %v677_v8 = vadd.f32 %v675_v6, %v667_v5 }
 0x209   :  { %1850 = vtanh.f32 %v677_v8 }
 0x20f   :  { %v1851_v9 = vpop.eup %1850 }
 0x210   :  { %680 = vrot.lane.b32.xlu1 %v1851_v9, %s1968_s26 }
 0x282   :  { %v681_v10 = vpop.permute.xlu1 %680 }
 0x283   :  { %v683_v11 = vmul.f32 %v681_v10, %v664_v3 }
 0x285   :  { %685 = vrot.lane.b32.xlu1 %v683_v11, %s1969_s27 }
 0x2f7   :  { %v686_v12 = vpop.permute.xlu1 %685 }
 0x2f8   :  { %688 = vst.msk [vmem:[#allocation3] sm:$0xff] %vm497_vm3, %v686_v12  ;;  %1796 = vmatmul.msk.f32.vlgmr.msra.gmra.mxu1 %vm497_vm3, %v686_v12 }
 0x2f9   :  { %1256 = vmatpush.msra.mxu1 %v2052_v7 }
 0x375   :  { %v709_v14 = vpop.f32.mrf.mxu1 }
 0x376   :  { %v712_v15 = vadd.f32 %v709_v14, %v689_v13 }
 0x378   :  { %1852 = vtanh.f32 %v712_v15  ;;  %v1797_v17 = vmul.f32 -1.442695, %v712_v15 }
 0x37a   :  { %1854 = vpow2.f32 %v1797_v17 }
 0x37e   :  { %v1853_v16 = vpop.eup %1852 }
 0x37f   :  { %735 = vrot.lane.b32.xlu2 %v1853_v16, %s1966_s25 }
 0x380   :  { %v1855_v18 = vpop.eup %1854 }
 0x381   :  { %v716_v19 = vadd.f32 1.0, %v1855_v18 }
 0x383   :  { %1856 = vrcp.f32 %v716_v19  ;;  %v728_v25 = vand.u32 2147483648, %v716_v19  ;;  %vm722_vm9 = vweird.f32 %v716_v19  ;;  %v726_v26 = vand.u32 2147483647, %v716_v19 }
 0x385   :  { %v729_v28 = vor.u32 1.1754944e-38, %v728_v25  ;;  %vm727_vm11 = vcmp.eq.f32.partialorder %v726_v26, 8.507059e+37 }
 0x389   :  { %v1857_v20 = vpop.eup %1856 }
 0x38a   :  { %v718_v21 = vmul.f32 %v1857_v20, %v716_v19  ;;  %vm723_vm8 = vweird.f32 %v1857_v20 }
 0x38b   :  { %vm724_vm10 = vmor %vm722_vm9, %vm723_vm8 }
 0x38c   :  { %v719_v22 = vsub.f32 1.0, %v718_v21 }
 0x38e   :  { %v720_v23 = vmul.f32 %v1857_v20, %v719_v22 }
 0x390   :  { %v721_v24 = vadd.f32 %v1857_v20, %v720_v23 }
 0x392   :  { %v725_v27 = vsel %vm724_vm10, %v1857_v20, %v721_v24 }
 0x393   :  { %v730_v30 = vsel %vm727_vm11, %v729_v28, %v725_v27  ;;  %v890_v28 = vld [vmem:[#allocation2 + $0x20] sm:$0xff] }
 0x394   :  { %v733_v32 = vmul.f32 %v730_v30, %v677_v8 }
 0x3d9   :  { %v736_v29 = vpop.permute.xlu2 %735 }
 0x3da   :  { %v738_v31 = vmul.f32 %v736_v29, %v730_v30 }
 0x3dc   :  { %740 = vrot.lane.b32.xlu2 %v738_v31, %s1967_s5 }
 0x436   :  { %v741_v33 = vpop.permute.xlu2 %740 }
 0x437   :  { %v743_v34 = vadd.f32 %v741_v33, %v733_v32 }
 0x439   :  { %1858 = vtanh.f32 %v743_v34 }
 0x43f   :  { %v1859_v35 = vpop.eup %1858 }
 0x440   :  { %746 = vrot.lane.b32.xlu0 %v1859_v35, %s1968_s26 }
 0x4b2   :  { %v747_v36 = vpop.permute.xlu0 %746 }
 0x4b3   :  { %v2210_v37 = vmul.f32 %v747_v36, %v730_v30 }
 0x4b5   :  { %757 = vrot.lane.b32.xlu1 %v2210_v37, %s1969_s27 }
 0x527   :  { %v758_v38 = vpop.permute.xlu1 %757 }
 0x528   :  { %1798 = vmatmul.msk.f32.vlgmr.msrb.gmra.mxu2 %vm497_vm3, %v758_v38 }
 0x529   :  { %1325 = vmatpush.msrb.mxu2 %v2052_v7 }
 0x5ab   :  { %v778_v40 = vpop.f32.mrf.mxu2 }
 0x5ac   :  { %v781_v41 = vadd.f32 %v778_v40, %v756_v39 }
 0x5ae   :  { %1860 = vtanh.f32 %v781_v41  ;;  %v1799_v43 = vmul.f32 -1.442695, %v781_v41 }
 0x5b0   :  { %1862 = vpow2.f32 %v1799_v43 }
 0x5b4   :  { %v1861_v42 = vpop.eup %1860 }
 0x5b5   :  { %804 = vrot.lane.b32.xlu2 %v1861_v42, %s1966_s25 }
 0x5b6   :  { %v1863_v44 = vpop.eup %1862 }
 0x5b7   :  { %v785_v45 = vadd.f32 1.0, %v1863_v44 }
 0x5b9   :  { %1864 = vrcp.f32 %v785_v45  ;;  %v797_v51 = vand.u32 2147483648, %v785_v45  ;;  %vm791_vm13 = vweird.f32 %v785_v45  ;;  %v795_v52 = vand.u32 2147483647, %v785_v45 }
 0x5bb   :  { %v798_v54 = vor.u32 1.1754944e-38, %v797_v51  ;;  %vm796_vm15 = vcmp.eq.f32.partialorder %v795_v52, 8.507059e+37 }
 0x5bf   :  { %v1865_v46 = vpop.eup %1864 }
 0x5c0   :  { %v787_v47 = vmul.f32 %v1865_v46, %v785_v45  ;;  %vm792_vm12 = vweird.f32 %v1865_v46 }
 0x5c1   :  { %vm793_vm14 = vmor %vm791_vm13, %vm792_vm12 }
 0x5c2   :  { %v788_v48 = vsub.f32 1.0, %v787_v47 }
 0x5c4   :  { %v789_v49 = vmul.f32 %v1865_v46, %v788_v48 }
 0x5c6   :  { %v790_v50 = vadd.f32 %v1865_v46, %v789_v49 }
 0x5c8   :  { %v794_v53 = vsel %vm793_vm14, %v1865_v46, %v790_v50 }
 0x5c9   :  { %v799_v56 = vsel %vm796_vm15, %v798_v54, %v794_v53 }
 0x5ca   :  { %v802_v58 = vmul.f32 %v799_v56, %v743_v34 }
 0x60f   :  { %v805_v55 = vpop.permute.xlu2 %804 }
 0x610   :  { %v807_v57 = vmul.f32 %v805_v55, %v799_v56  ;;  %v960_v55 = vld [vmem:[#allocation2 + $0x28] sm:$0xff] }
 0x612   :  { %809 = vrot.lane.b32.xlu0 %v807_v57, %s1967_s5 }
 0x684   :  { %v810_v59 = vpop.permute.xlu0 %809 }
 0x685   :  { %v812_v60 = vadd.f32 %v810_v59, %v802_v58 }
 0x687   :  { %1866 = vtanh.f32 %v812_v60 }
 0x68d   :  { %v1867_v61 = vpop.eup %1866 }
 0x68e   :  { %815 = vrot.lane.b32.xlu1 %v1867_v61, %s1968_s26 }
 0x700   :  { %v816_v62 = vpop.permute.xlu1 %815 }
 0x701   :  { %v2219_v63 = vmul.f32 %v816_v62, %v799_v56 }
 0x703   :  { %826 = vrot.lane.b32.xlu2 %v2219_v63, %s1969_s27 }
 0x75d   :  { %v827_v0 = vpop.permute.xlu2 %826 }
 0x75e   :  { %1800 = vmatmul.msk.f32.vlgmr.msra.gmra.mxu0 %vm497_vm3, %v827_v0 }
 0x75f   :  { %1187 = vmatpush.msra.mxu0 %v2052_v7 }
 0x7db   :  { %v847_v2 = vpop.f32.mrf.mxu0 }
 0x7dc   :  { %v850_v3 = vadd.f32 %v847_v2, %v825_v1 }
 0x7de   :  { %1868 = vtanh.f32 %v850_v3  ;;  %v1801_v5 = vmul.f32 -1.442695, %v850_v3 }
 0x7e0   :  { %1870 = vpow2.f32 %v1801_v5 }
 0x7e4   :  { %v1869_v4 = vpop.eup %1868 }
 0x7e5   :  { %873 = vrot.lane.b32.xlu0 %v1869_v4, %s1966_s25 }
 0x7e6   :  { %v1871_v6 = vpop.eup %1870 }
 0x7e7   :  { %v854_v8 = vadd.f32 1.0, %v1871_v6 }
 0x7e9   :  { %1872 = vrcp.f32 %v854_v8  ;;  %v866_v14 = vand.u32 2147483648, %v854_v8  ;;  %vm860_vm1 = vweird.f32 %v854_v8  ;;  %v864_v15 = vand.u32 2147483647, %v854_v8 }
 0x7eb   :  { %v867_v17 = vor.u32 1.1754944e-38, %v866_v14  ;;  %vm865_vm4 = vcmp.eq.f32.partialorder %v864_v15, 8.507059e+37 }
 0x7ef   :  { %v1873_v9 = vpop.eup %1872 }
 0x7f0   :  { %v856_v10 = vmul.f32 %v1873_v9, %v854_v8  ;;  %vm861_vm0 = vweird.f32 %v1873_v9 }
 0x7f1   :  { %vm862_vm2 = vmor %vm860_vm1, %vm861_vm0 }
 0x7f2   :  { %v857_v11 = vsub.f32 1.0, %v856_v10 }
 0x7f4   :  { %v858_v12 = vmul.f32 %v1873_v9, %v857_v11 }
 0x7f6   :  { %v859_v13 = vadd.f32 %v1873_v9, %v858_v12 }
 0x7f8   :  { %v863_v16 = vsel %vm862_vm2, %v1873_v9, %v859_v13 }
 0x7f9   :  { %v868_v19 = vsel %vm865_vm4, %v867_v17, %v863_v16 }
 0x7fa   :  { %v871_v21 = vmul.f32 %v868_v19, %v812_v60 }
 0x857   :  { %v874_v18 = vpop.permute.xlu0 %873 }
 0x858   :  { %v876_v20 = vmul.f32 %v874_v18, %v868_v19  ;;  %v1964_v18 = vld [vmem:[%s2391_s4] sm:$0xff]  ;;  %s1970_s4 = smov 40  }
 0x85a   :  { %878 = vrot.lane.b32.xlu1 %v876_v20, %s1967_s5 }
 0x8cc   :  { %v879_v22 = vpop.permute.xlu1 %878 }
 0x8cd   :  { %v881_v23 = vadd.f32 %v879_v22, %v871_v21 }
 0x8cf   :  { %1874 = vtanh.f32 %v881_v23 }
 0x8d5   :  { %v1875_v24 = vpop.eup %1874 }
 0x8d6   :  { %884 = vrot.lane.b32.xlu2 %v1875_v24, %s1968_s26 }
 0x930   :  { %v885_v25 = vpop.permute.xlu2 %884 }
 0x931   :  { %v2228_v26 = vmul.f32 %v885_v25, %v868_v19  ;;  %v1029_v19 = vld [vmem:[#allocation2 + $0x30] sm:$0xff] }
 0x933   :  { %892 = vrot.lane.b32.xlu0 %v2228_v26, %s1969_s27 }
 0x9a5   :  { %v893_v27 = vpop.permute.xlu0 %892 }
 0x9a6   :  { %1802 = vmatmul.msk.f32.vlgmr.msrb.gmra.mxu0 %vm497_vm3, %v893_v27 }
 0x9a7   :  { %1463 = vmatpush.msrb.mxu0 %v2052_v7 }
 0xa23   :  { %v913_v29 = vpop.f32.mrf.mxu0 }
 0xa24   :  { %v916_v30 = vadd.f32 %v913_v29, %v890_v28 }
 0xa26   :  { %1876 = vtanh.f32 %v916_v30  ;;  %v1803_v32 = vmul.f32 -1.442695, %v916_v30 }
 0xa28   :  { %1878 = vpow2.f32 %v1803_v32 }
 0xa2c   :  { %v1877_v31 = vpop.eup %1876 }
 0xa2d   :  { %939 = vrot.lane.b32.xlu1 %v1877_v31, %s1966_s25 }
 0xa2e   :  { %v1879_v33 = vpop.eup %1878 }
 0xa2f   :  { %v920_v34 = vadd.f32 1.0, %v1879_v33 }
 0xa31   :  { %1880 = vrcp.f32 %v920_v34  ;;  %v932_v41 = vand.u32 2147483648, %v920_v34  ;;  %vm926_vm6 = vweird.f32 %v920_v34  ;;  %v930_v42 = vand.u32 2147483647, %v920_v34 }
 0xa33   :  { %v933_v44 = vor.u32 1.1754944e-38, %v932_v41  ;;  %vm931_vm8 = vcmp.eq.f32.partialorder %v930_v42, 8.507059e+37 }
 0xa37   :  { %v1881_v35 = vpop.eup %1880 }
 0xa38   :  { %v922_v36 = vmul.f32 %v1881_v35, %v920_v34  ;;  %vm927_vm5 = vweird.f32 %v1881_v35 }
 0xa39   :  { %vm928_vm7 = vmor %vm926_vm6, %vm927_vm5 }
 0xa3a   :  { %v923_v38 = vsub.f32 1.0, %v922_v36 }
 0xa3c   :  { %v924_v39 = vmul.f32 %v1881_v35, %v923_v38 }
 0xa3e   :  { %v925_v40 = vadd.f32 %v1881_v35, %v924_v39 }
 0xa40   :  { %v929_v43 = vsel %vm928_vm7, %v1881_v35, %v925_v40 }
 0xa41   :  { %v934_v46 = vsel %vm931_vm8, %v933_v44, %v929_v43 }
 0xa42   :  { %v937_v48 = vmul.f32 %v934_v46, %v881_v23 }
 0xa9f   :  { %v940_v45 = vpop.permute.xlu1 %939 }
 0xaa0   :  { %v942_v47 = vmul.f32 %v940_v45, %v934_v46 }
 0xaa2   :  { %944 = vrot.lane.b32.xlu2 %v942_v47, %s1967_s5  ;;  %v1098_v47 = vld [vmem:[#allocation2 + $0x38] sm:$0xff] }
 0xafc   :  { %v945_v49 = vpop.permute.xlu2 %944 }
 0xafd   :  { %v947_v50 = vadd.f32 %v945_v49, %v937_v48 }
 0xaff   :  { %1882 = vtanh.f32 %v947_v50 }
 0xb05   :  { %v1883_v51 = vpop.eup %1882 }
 0xb06   :  { %950 = vrot.lane.b32.xlu0 %v1883_v51, %s1968_s26 }
 0xb78   :  { %v951_v52 = vpop.permute.xlu0 %950 }
 0xb79   :  { %v2237_v53 = vmul.f32 %v951_v52, %v934_v46 }
 0xb7b   :  { %961 = vrot.lane.b32.xlu1 %v2237_v53, %s1969_s27 }
 0xbed   :  { %v962_v54 = vpop.permute.xlu1 %961 }
 0xbee   :  { %1804 = vmatmul.msk.f32.vlgmr.msrb.gmra.mxu1 %vm497_vm3, %v962_v54 }
 0xbef   :  { %1532 = vmatpush.msrb.mxu1 %v2052_v7 }
 0xc6b   :  { %v982_v56 = vpop.f32.mrf.mxu1 }
 0xc6c   :  { %v985_v57 = vadd.f32 %v982_v56, %v960_v55 }
 0xc6e   :  { %1884 = vtanh.f32 %v985_v57  ;;  %v1805_v59 = vmul.f32 -1.442695, %v985_v57 }
 0xc70   :  { %1886 = vpow2.f32 %v1805_v59 }
 0xc74   :  { %v1885_v58 = vpop.eup %1884 }
 0xc75   :  { %1008 = vrot.lane.b32.xlu2 %v1885_v58, %s1966_s25 }
 0xc76   :  { %v1887_v60 = vpop.eup %1886 }
 0xc77   :  { %v989_v61 = vadd.f32 1.0, %v1887_v60 }
 0xc79   :  { %1888 = vrcp.f32 %v989_v61  ;;  %v1001_v4 = vand.u32 2147483648, %v989_v61  ;;  %vm995_vm10 = vweird.f32 %v989_v61  ;;  %v999_v7 = vand.u32 2147483647, %v989_v61 }
 0xc7b   :  { %v1002_v6 = vor.u32 1.1754944e-38, %v1001_v4  ;;  %vm1000_vm12 = vcmp.eq.f32.partialorder %v999_v7, 8.507059e+37 }
 0xc7f   :  { %v1889_v62 = vpop.eup %1888 }
 0xc80   :  { %v991_v0 = vmul.f32 %v1889_v62, %v989_v61  ;;  %vm996_vm9 = vweird.f32 %v1889_v62 }
 0xc81   :  { %vm997_vm11 = vmor %vm995_vm10, %vm996_vm9 }
 0xc82   :  { %v992_v1 = vsub.f32 1.0, %v991_v0 }
 0xc84   :  { %v993_v2 = vmul.f32 %v1889_v62, %v992_v1 }
 0xc86   :  { %v994_v3 = vadd.f32 %v1889_v62, %v993_v2 }
 0xc88   :  { %v998_v5 = vsel %vm997_vm11, %v1889_v62, %v994_v3 }
 0xc89   :  { %v1003_v9 = vsel %vm1000_vm12, %v1002_v6, %v998_v5 }
 0xc8a   :  { %v1006_v11 = vmul.f32 %v1003_v9, %v947_v50 }
 0xccf   :  { %v1009_v8 = vpop.permute.xlu2 %1008 }
 0xcd0   :  { %v1011_v10 = vmul.f32 %v1009_v8, %v1003_v9 }
 0xcd2   :  { %1013 = vrot.lane.b32.xlu0 %v1011_v10, %s1967_s5 }
 0xd44   :  { %v1014_v12 = vpop.permute.xlu0 %1013 }
 0xd45   :  { %v1016_v13 = vadd.f32 %v1014_v12, %v1006_v11  ;;  %v1167_v11 = vld [vmem:[#allocation2 + $0x40] sm:$0xff] }
 0xd47   :  { %1890 = vtanh.f32 %v1016_v13 }
 0xd4d   :  { %v1891_v14 = vpop.eup %1890 }
 0xd4e   :  { %1019 = vrot.lane.b32.xlu1 %v1891_v14, %s1968_s26 }
 0xdc0   :  { %v1020_v15 = vpop.permute.xlu1 %1019 }
 0xdc1   :  { %v2246_v16 = vmul.f32 %v1020_v15, %v1003_v9 }
 0xdc3   :  { %1030 = vrot.lane.b32.xlu2 %v2246_v16, %s1969_s27 }
 0xe1d   :  { %v1031_v17 = vpop.permute.xlu2 %1030 }
 0xe1e   :  { %1806 = vmatmul.msk.f32.vlgmr.msra.gmra.mxu2 %vm497_vm3, %v1031_v17 }
 0xe1f   :  { %1601 = vmatpush.msra.mxu2 %v1964_v18 }
 0xea1   :  { %v1051_v20 = vpop.f32.mrf.mxu2 }
 0xea2   :  { %v1054_v21 = vadd.f32 %v1051_v20, %v1029_v19 }
 0xea4   :  { %1892 = vtanh.f32 %v1054_v21  ;;  %v1807_v23 = vmul.f32 -1.442695, %v1054_v21 }
 0xea6   :  { %1894 = vpow2.f32 %v1807_v23 }
 0xeaa   :  { %v1893_v22 = vpop.eup %1892 }
 0xeab   :  { %1077 = vrot.lane.b32.xlu0 %v1893_v22, %s1966_s25 }
 0xeac   :  { %v1895_v24 = vpop.eup %1894 }
 0xead   :  { %v1058_v25 = vadd.f32 1.0, %v1895_v24 }
 0xeaf   :  { %1896 = vrcp.f32 %v1058_v25  ;;  %v1070_v32 = vand.u32 2147483648, %v1058_v25  ;;  %vm1064_vm14 = vweird.f32 %v1058_v25  ;;  %v1068_v33 = vand.u32 2147483647, %v1058_v25 }
 0xeb1   :  { %v1071_v35 = vor.u32 1.1754944e-38, %v1070_v32  ;;  %vm1069_vm0 = vcmp.eq.f32.partialorder %v1068_v33, 8.507059e+37 }
 0xeb5   :  { %v1897_v27 = vpop.eup %1896 }
 0xeb6   :  { %v1060_v28 = vmul.f32 %v1897_v27, %v1058_v25  ;;  %vm1065_vm13 = vweird.f32 %v1897_v27 }
 0xeb7   :  { %vm1066_vm15 = vmor %vm1064_vm14, %vm1065_vm13 }
 0xeb8   :  { %v1061_v29 = vsub.f32 1.0, %v1060_v28 }
 0xeba   :  { %v1062_v30 = vmul.f32 %v1897_v27, %v1061_v29 }
 0xebc   :  { %v1063_v31 = vadd.f32 %v1897_v27, %v1062_v30 }
 0xebe   :  { %v1067_v34 = vsel %vm1066_vm15, %v1897_v27, %v1063_v31 }
 0xebf   :  { %v1072_v38 = vsel %vm1069_vm0, %v1071_v35, %v1067_v34 }
 0xec0   :  { %v1075_v40 = vmul.f32 %v1072_v38, %v1016_v13 }
 0xf1d   :  { %v1078_v36 = vpop.permute.xlu0 %1077 }
 0xf1e   :  { %v1080_v39 = vmul.f32 %v1078_v36, %v1072_v38 }
 0xf20   :  { %1082 = vrot.lane.b32.xlu1 %v1080_v39, %s1967_s5 }
 0xf92   :  { %v1083_v41 = vpop.permute.xlu1 %1082 }
 0xf93   :  { %v1085_v42 = vadd.f32 %v1083_v41, %v1075_v40  ;;  %v1236_v40 = vld [vmem:[#allocation2 + $0x48] sm:$0xff] }
 0xf95   :  { %1898 = vtanh.f32 %v1085_v42 }
 0xf9b   :  { %v1899_v43 = vpop.eup %1898 }
 0xf9c   :  { %1088 = vrot.lane.b32.xlu2 %v1899_v43, %s1968_s26 }
 0xff6   :  { %v1089_v44 = vpop.permute.xlu2 %1088 }
 0xff7   :  { %v2257_v45 = vmul.f32 %v1089_v44, %v1072_v38 }
 0xff9   :  { %1099 = vrot.lane.b32.xlu0 %v2257_v45, %s1969_s27 }
0x106b   :  { %v1100_v46 = vpop.permute.xlu0 %1099 }
0x106c   :  { %1808 = vmatmul.msk.f32.vlgmr.msrb.gmra.mxu3 %vm497_vm3, %v1100_v46 }
0x10ef   :  { %v1120_v48 = vpop.f32.mrf.mxu3 }
0x10f0   :  { %v1123_v49 = vadd.f32 %v1120_v48, %v1098_v47 }
0x10f2   :  { %1900 = vtanh.f32 %v1123_v49  ;;  %v1809_v51 = vmul.f32 -1.442695, %v1123_v49 }
0x10f4   :  { %1902 = vpow2.f32 %v1809_v51 }
0x10f8   :  { %v1901_v50 = vpop.eup %1900 }
0x10f9   :  { %1146 = vrot.lane.b32.xlu1 %v1901_v50, %s1966_s25 }
0x10fa   :  { %v1903_v52 = vpop.eup %1902 }
0x10fb   :  { %v1127_v54 = vadd.f32 1.0, %v1903_v52 }
0x10fd   :  { %1904 = vrcp.f32 %v1127_v54  ;;  %v1139_v60 = vand.u32 2147483648, %v1127_v54  ;;  %vm1133_vm2 = vweird.f32 %v1127_v54  ;;  %v1137_v61 = vand.u32 2147483647, %v1127_v54 }
0x10ff   :  { %v1140_v0 = vor.u32 1.1754944e-38, %v1139_v60  ;;  %vm1138_vm5 = vcmp.eq.f32.partialorder %v1137_v61, 8.507059e+37 }
0x1103   :  { %v1905_v55 = vpop.eup %1904 }
0x1104   :  { %v1129_v56 = vmul.f32 %v1905_v55, %v1127_v54  ;;  %vm1134_vm1 = vweird.f32 %v1905_v55 }
0x1105   :  { %vm1135_vm4 = vmor %vm1133_vm2, %vm1134_vm1 }
0x1106   :  { %v1130_v57 = vsub.f32 1.0, %v1129_v56 }
0x1108   :  { %v1131_v58 = vmul.f32 %v1905_v55, %v1130_v57 }
0x110a   :  { %v1132_v59 = vadd.f32 %v1905_v55, %v1131_v58 }
0x110c   :  { %v1136_v62 = vsel %vm1135_vm4, %v1905_v55, %v1132_v59 }
0x110d   :  { %v1141_v2 = vsel %vm1138_vm5, %v1140_v0, %v1136_v62 }
0x110e   :  { %v1144_v4 = vmul.f32 %v1141_v2, %v1085_v42 }
0x116b   :  { %v1147_v1 = vpop.permute.xlu1 %1146 }
0x116c   :  { %v1149_v3 = vmul.f32 %v1147_v1, %v1141_v2 }
0x116e   :  { %1151 = vrot.lane.b32.xlu2 %v1149_v3, %s1967_s5 }
0x11c8   :  { %v1152_v7 = vpop.permute.xlu2 %1151 }
0x11c9   :  { %v1154_v5 = vadd.f32 %v1152_v7, %v1144_v4  ;;  %v1305_v7 = vld [vmem:[#allocation2 + $0x50] sm:$0xff] }
0x11cb   :  { %1906 = vtanh.f32 %v1154_v5 }
0x11d1   :  { %v1907_v6 = vpop.eup %1906 }
0x11d2   :  { %1157 = vrot.lane.b32.xlu0 %v1907_v6, %s1968_s26 }
0x1244   :  { %v1158_v8 = vpop.permute.xlu0 %1157 }
0x1245   :  { %v2265_v9 = vmul.f32 %v1158_v8, %v1141_v2 }
0x1247   :  { %1168 = vrot.lane.b32.xlu1 %v2265_v9, %s1969_s27 }
0x12b9   :  { %v1169_v10 = vpop.permute.xlu1 %1168 }
0x12ba   :  { %1810 = vmatmul.msk.f32.vlgmr.msra.gmra.mxu0 %vm497_vm3, %v1169_v10 }
0x1337   :  { %v1189_v12 = vpop.f32.mrf.mxu0 }
0x1338   :  { %v1192_v13 = vadd.f32 %v1189_v12, %v1167_v11 }
0x133a   :  { %1908 = vtanh.f32 %v1192_v13  ;;  %v1811_v15 = vmul.f32 -1.442695, %v1192_v13 }
0x133c   :  { %1910 = vpow2.f32 %v1811_v15 }
0x1340   :  { %v1909_v14 = vpop.eup %1908 }
0x1341   :  { %1215 = vrot.lane.b32.xlu2 %v1909_v14, %s1966_s25 }
0x1342   :  { %v1911_v17 = vpop.eup %1910 }
0x1343   :  { %v1196_v18 = vadd.f32 1.0, %v1911_v17 }
0x1345   :  { %1912 = vrcp.f32 %v1196_v18  ;;  %v1208_v24 = vand.u32 2147483648, %v1196_v18  ;;  %vm1202_vm7 = vweird.f32 %v1196_v18  ;;  %v1206_v25 = vand.u32 2147483647, %v1196_v18 }
0x1347   :  { %v1209_v28 = vor.u32 1.1754944e-38, %v1208_v24  ;;  %vm1207_vm9 = vcmp.eq.f32.partialorder %v1206_v25, 8.507059e+37 }
0x134b   :  { %v1913_v19 = vpop.eup %1912 }
0x134c   :  { %v1198_v20 = vmul.f32 %v1913_v19, %v1196_v18  ;;  %vm1203_vm6 = vweird.f32 %v1913_v19 }
0x134d   :  { %vm1204_vm8 = vmor %vm1202_vm7, %vm1203_vm6 }
0x134e   :  { %v1199_v21 = vsub.f32 1.0, %v1198_v20 }
0x1350   :  { %v1200_v22 = vmul.f32 %v1913_v19, %v1199_v21 }
0x1352   :  { %v1201_v23 = vadd.f32 %v1913_v19, %v1200_v22 }
0x1354   :  { %v1205_v27 = vsel %vm1204_vm8, %v1913_v19, %v1201_v23 }
0x1355   :  { %v1210_v30 = vsel %vm1207_vm9, %v1209_v28, %v1205_v27 }
0x1356   :  { %v1213_v32 = vmul.f32 %v1210_v30, %v1154_v5 }
0x139b   :  { %v1216_v29 = vpop.permute.xlu2 %1215 }
0x139c   :  { %v1218_v31 = vmul.f32 %v1216_v29, %v1210_v30 }
0x139e   :  { %1220 = vrot.lane.b32.xlu0 %v1218_v31, %s1967_s5 }
0x1410   :  { %v1221_v33 = vpop.permute.xlu0 %1220 }
0x1411   :  { %v1223_v34 = vadd.f32 %v1221_v33, %v1213_v32 }
0x1413   :  { %1914 = vtanh.f32 %v1223_v34 }
0x1419   :  { %v1915_v35 = vpop.eup %1914 }
0x141a   :  { %1226 = vrot.lane.b32.xlu1 %v1915_v35, %s1968_s26 }
0x148c   :  { %v1227_v36 = vpop.permute.xlu1 %1226 }
0x148d   :  { %v2273_v38 = vmul.f32 %v1227_v36, %v1210_v30 }
0x148f   :  { %1237 = vrot.lane.b32.xlu2 %v2273_v38, %s1969_s27 }
0x14e9   :  { %v1238_v39 = vpop.permute.xlu2 %1237 }
0x14ea   :  { %1812 = vmatmul.msk.f32.vlgmr.msra.gmra.mxu1 %vm497_vm3, %v1238_v39 }
0x1567   :  { %v1258_v41 = vpop.f32.mrf.mxu1 }
0x1568   :  { %v1261_v42 = vadd.f32 %v1258_v41, %v1236_v40 }
0x156a   :  { %1916 = vtanh.f32 %v1261_v42  ;;  %v1813_v44 = vmul.f32 -1.442695, %v1261_v42 }
0x156c   :  { %1918 = vpow2.f32 %v1813_v44 }
0x1570   :  { %v1917_v43 = vpop.eup %1916 }
0x1571   :  { %1284 = vrot.lane.b32.xlu0 %v1917_v43, %s1966_s25 }
0x1572   :  { %v1919_v46 = vpop.eup %1918 }
0x1573   :  { %v1265_v47 = vadd.f32 1.0, %v1919_v46 }
0x1575   :  { %1920 = vrcp.f32 %v1265_v47  ;;  %v1277_v54 = vand.u32 2147483648, %v1265_v47  ;;  %vm1271_vm11 = vweird.f32 %v1265_v47  ;;  %v1275_v55 = vand.u32 2147483647, %v1265_v47 }
0x1577   :  { %v1278_v57 = vor.u32 1.1754944e-38, %v1277_v54  ;;  %vm1276_vm13 = vcmp.eq.f32.partialorder %v1275_v55, 8.507059e+37 }
0x157b   :  { %v1921_v48 = vpop.eup %1920 }
0x157c   :  { %v1267_v49 = vmul.f32 %v1921_v48, %v1265_v47  ;;  %vm1272_vm10 = vweird.f32 %v1921_v48 }
0x157d   :  { %vm1273_vm12 = vmor %vm1271_vm11, %vm1272_vm10 }
0x157e   :  { %v1268_v50 = vsub.f32 1.0, %v1267_v49 }
0x1580   :  { %v1269_v51 = vmul.f32 %v1921_v48, %v1268_v50 }
0x1582   :  { %v1270_v52 = vadd.f32 %v1921_v48, %v1269_v51 }
0x1584   :  { %v1274_v56 = vsel %vm1273_vm12, %v1921_v48, %v1270_v52 }
0x1585   :  { %v1279_v59 = vsel %vm1276_vm13, %v1278_v57, %v1274_v56 }
0x1586   :  { %v1282_v61 = vmul.f32 %v1279_v59, %v1223_v34  ;;  %v1374_v34 = vld [vmem:[#allocation2 + $0x58] sm:$0xff] }
0x15e3   :  { %v1285_v58 = vpop.permute.xlu0 %1284 }
0x15e4   :  { %v1287_v60 = vmul.f32 %v1285_v58, %v1279_v59 }
0x15e6   :  { %1289 = vrot.lane.b32.xlu1 %v1287_v60, %s1967_s5 }
0x1658   :  { %v1290_v62 = vpop.permute.xlu1 %1289 }
0x1659   :  { %v1292_v0 = vadd.f32 %v1290_v62, %v1282_v61 }
0x165b   :  { %1922 = vtanh.f32 %v1292_v0 }
0x1661   :  { %v1923_v1 = vpop.eup %1922 }
0x1662   :  { %1295 = vrot.lane.b32.xlu2 %v1923_v1, %s1968_s26  ;;  %v1443_v1 = vld [vmem:[#allocation2 + $0x60] sm:$0xff] }
0x16bc   :  { %v1296_v2 = vpop.permute.xlu2 %1295 }
0x16bd   :  { %v2281_v3 = vmul.f32 %v1296_v2, %v1279_v59 }
0x16bf   :  { %1306 = vrot.lane.b32.xlu0 %v2281_v3, %s1969_s27 }
0x1731   :  { %v1307_v4 = vpop.permute.xlu0 %1306 }
0x1732   :  { %1814 = vmatmul.msk.f32.vlgmr.msrb.gmra.mxu2 %vm497_vm3, %v1307_v4 }
0x17b5   :  { %v1327_v5 = vpop.f32.mrf.mxu2 }
0x17b6   :  { %v1330_v6 = vadd.f32 %v1327_v5, %v1305_v7 }
0x17b8   :  { %1924 = vtanh.f32 %v1330_v6  ;;  %v1815_v10 = vmul.f32 -1.442695, %v1330_v6 }
0x17ba   :  { %1926 = vpow2.f32 %v1815_v10 }
0x17be   :  { %v1925_v8 = vpop.eup %1924 }
0x17bf   :  { %1353 = vrot.lane.b32.xlu1 %v1925_v8, %s1966_s25 }
0x17c0   :  { %v1927_v11 = vpop.eup %1926 }
0x17c1   :  { %v1334_v12 = vadd.f32 1.0, %v1927_v11 }
0x17c3   :  { %1928 = vrcp.f32 %v1334_v12  ;;  %v1346_v19 = vand.u32 2147483648, %v1334_v12  ;;  %vm1340_vm15 = vweird.f32 %v1334_v12  ;;  %v1344_v20 = vand.u32 2147483647, %v1334_v12 }
0x17c5   :  { %v1347_v22 = vor.u32 1.1754944e-38, %v1346_v19  ;;  %vm1345_vm1 = vcmp.eq.f32.partialorder %v1344_v20, 8.507059e+37 }
0x17c9   :  { %v1929_v13 = vpop.eup %1928 }
0x17ca   :  { %v1336_v14 = vmul.f32 %v1929_v13, %v1334_v12  ;;  %vm1341_vm14 = vweird.f32 %v1929_v13 }
0x17cb   :  { %vm1342_vm0 = vmor %vm1340_vm15, %vm1341_vm14 }
0x17cc   :  { %v1337_v15 = vsub.f32 1.0, %v1336_v14 }
0x17ce   :  { %v1338_v17 = vmul.f32 %v1929_v13, %v1337_v15 }
0x17d0   :  { %v1339_v18 = vadd.f32 %v1929_v13, %v1338_v17 }
0x17d2   :  { %v1343_v21 = vsel %vm1342_vm0, %v1929_v13, %v1339_v18 }
0x17d3   :  { %v1348_v24 = vsel %vm1345_vm1, %v1347_v22, %v1343_v21 }
0x17d4   :  { %v1351_v27 = vmul.f32 %v1348_v24, %v1292_v0 }
0x1831   :  { %v1354_v23 = vpop.permute.xlu1 %1353 }
0x1832   :  { %v1356_v25 = vmul.f32 %v1354_v23, %v1348_v24 }
0x1834   :  { %1358 = vrot.lane.b32.xlu2 %v1356_v25, %s1967_s5 }
0x188e   :  { %v1359_v28 = vpop.permute.xlu2 %1358 }
0x188f   :  { %v1361_v29 = vadd.f32 %v1359_v28, %v1351_v27 }
0x1891   :  { %1930 = vtanh.f32 %v1361_v29 }
0x1897   :  { %v1931_v30 = vpop.eup %1930 }
0x1898   :  { %1364 = vrot.lane.b32.xlu0 %v1931_v30, %s1968_s26 }
0x190a   :  { %v1365_v31 = vpop.permute.xlu0 %1364 }
0x190b   :  { %v2289_v32 = vmul.f32 %v1365_v31, %v1348_v24  ;;  %v1512_v31 = vld [vmem:[#allocation2 + $0x68] sm:$0xff] }
0x190d   :  { %1375 = vrot.lane.b32.xlu1 %v2289_v32, %s1969_s27 }
0x197f   :  { %v1376_v33 = vpop.permute.xlu1 %1375 }
0x1980   :  { %1816 = vmatmul.msk.f32.vlgmr.msra.gmra.mxu3 %vm497_vm3, %v1376_v33 }
0x1a03   :  { %v1396_v35 = vpop.f32.mrf.mxu3 }
0x1a04   :  { %v1399_v36 = vadd.f32 %v1396_v35, %v1374_v34 }
0x1a06   :  { %1932 = vtanh.f32 %v1399_v36  ;;  %v1817_v40 = vmul.f32 -1.442695, %v1399_v36 }
0x1a08   :  { %1934 = vpow2.f32 %v1817_v40 }
0x1a0c   :  { %v1933_v39 = vpop.eup %1932 }
0x1a0d   :  { %1422 = vrot.lane.b32.xlu2 %v1933_v39, %s1966_s25 }
0x1a0e   :  { %v1935_v41 = vpop.eup %1934 }
0x1a0f   :  { %v1403_v42 = vadd.f32 1.0, %v1935_v41 }
0x1a11   :  { %1936 = vrcp.f32 %v1403_v42  ;;  %v1415_v49 = vand.u32 2147483648, %v1403_v42  ;;  %vm1409_vm4 = vweird.f32 %v1403_v42  ;;  %v1413_v50 = vand.u32 2147483647, %v1403_v42 }
0x1a13   :  { %v1416_v52 = vor.u32 1.1754944e-38, %v1415_v49  ;;  %vm1414_vm6 = vcmp.eq.f32.partialorder %v1413_v50, 8.507059e+37 }
0x1a17   :  { %v1937_v43 = vpop.eup %1936 }
0x1a18   :  { %v1405_v44 = vmul.f32 %v1937_v43, %v1403_v42  ;;  %vm1410_vm2 = vweird.f32 %v1937_v43 }
0x1a19   :  { %vm1411_vm5 = vmor %vm1409_vm4, %vm1410_vm2  ;;  %vm754_vm2 = vcmask 130112   ;;  %vm823_vm4 = vcmask 195712  }
0x1a1a   :  { %v1406_v46 = vsub.f32 1.0, %v1405_v44 }
0x1a1c   :  { %v1407_v47 = vmul.f32 %v1937_v43, %v1406_v46 }
0x1a1e   :  { %v1408_v48 = vadd.f32 %v1937_v43, %v1407_v47 }
0x1a20   :  { %v1412_v51 = vsel %vm1411_vm5, %v1937_v43, %v1408_v48  ;;  %vm888_vm5 = vcmask 261312  }
0x1a21   :  { %v1417_v55 = vsel %vm1414_vm6, %v1416_v52, %v1412_v51  ;;  %vm958_vm6 = vcmask 326912  }
0x1a22   :  { %v1420_v57 = vmul.f32 %v1417_v55, %v1361_v29 }
0x1a67   :  { %v1423_v54 = vpop.permute.xlu2 %1422 }
0x1a68   :  { %v1425_v56 = vmul.f32 %v1423_v54, %v1417_v55 }
0x1a6a   :  { %1427 = vrot.lane.b32.xlu0 %v1425_v56, %s1967_s5 }
0x1adc   :  { %v1428_v58 = vpop.permute.xlu0 %1427 }
0x1add   :  { %v1430_v59 = vadd.f32 %v1428_v58, %v1420_v57 }
0x1adf   :  { %1938 = vtanh.f32 %v1430_v59 }
0x1ae5   :  { %v1939_v60 = vpop.eup %1938 }
0x1ae6   :  { %1433 = vrot.lane.b32.xlu1 %v1939_v60, %s1968_s26 }
0x1b58   :  { %v1434_v61 = vpop.permute.xlu1 %1433 }
0x1b59   :  { %v2297_v62 = vmul.f32 %v1434_v61, %v1417_v55 }
0x1b5b   :  { %1444 = vrot.lane.b32.xlu2 %v2297_v62, %s1969_s27 }
0x1bb5   :  { %v1445_v0 = vpop.permute.xlu2 %1444 }
0x1bb6   :  { %1818 = vmatmul.msk.f32.vlgmr.msrb.gmra.mxu0 %vm497_vm3, %v1445_v0  ;;  %v1581_v0 = vld [vmem:[#allocation2 + $0x70] sm:$0xff] }
0x1c33   :  { %v1465_v2 = vpop.f32.mrf.mxu0 }
0x1c34   :  { %v1468_v4 = vadd.f32 %v1465_v2, %v1443_v1 }
0x1c36   :  { %1940 = vtanh.f32 %v1468_v4  ;;  %v1819_v5 = vmul.f32 -1.442695, %v1468_v4 }
0x1c38   :  { %1942 = vpow2.f32 %v1819_v5 }
0x1c3c   :  { %v1941_v7 = vpop.eup %1940 }
0x1c3d   :  { %1491 = vrot.lane.b32.xlu0 %v1941_v7, %s1966_s25 }
0x1c3e   :  { %v1943_v6 = vpop.eup %1942 }
0x1c3f   :  { %v1472_v8 = vadd.f32 1.0, %v1943_v6 }
0x1c41   :  { %1944 = vrcp.f32 %v1472_v8  ;;  %v1484_v15 = vand.u32 2147483648, %v1472_v8  ;;  %vm1478_vm8 = vweird.f32 %v1472_v8  ;;  %v1482_v17 = vand.u32 2147483647, %v1472_v8 }
0x1c43   :  { %v1485_v19 = vor.u32 1.1754944e-38, %v1484_v15  ;;  %vm1483_vm10 = vcmp.eq.f32.partialorder %v1482_v17, 8.507059e+37 }
0x1c47   :  { %v1945_v10 = vpop.eup %1944 }
0x1c48   :  { %v1474_v11 = vmul.f32 %v1945_v10, %v1472_v8  ;;  %vm1479_vm7 = vweird.f32 %v1945_v10 }
0x1c49   :  { %vm1480_vm9 = vmor %vm1478_vm8, %vm1479_vm7  ;;  %vm1027_vm7 = vcmask 392512   ;;  %vm1096_vm8 = vcmask 458112  }
0x1c4a   :  { %v1475_v12 = vsub.f32 1.0, %v1474_v11 }
0x1c4c   :  { %v1476_v13 = vmul.f32 %v1945_v10, %v1475_v12 }
0x1c4e   :  { %v1477_v14 = vadd.f32 %v1945_v10, %v1476_v13 }
0x1c50   :  { %v1481_v18 = vsel %vm1480_vm9, %v1945_v10, %v1477_v14  ;;  %vm1165_vm9 = vcmask 523712  }
0x1c51   :  { %v1486_v21 = vsel %vm1483_vm10, %v1485_v19, %v1481_v18  ;;  %vm1234_vm10 = vcmask 589312  }
0x1c52   :  { %v1489_v23 = vmul.f32 %v1486_v21, %v1430_v59 }
0x1caf   :  { %v1492_v20 = vpop.permute.xlu0 %1491 }
0x1cb0   :  { %v1494_v22 = vmul.f32 %v1492_v20, %v1486_v21 }
0x1cb2   :  { %1496 = vrot.lane.b32.xlu1 %v1494_v22, %s1967_s5 }
0x1d24   :  { %v1497_v24 = vpop.permute.xlu1 %1496 }
0x1d25   :  { %v1499_v25 = vadd.f32 %v1497_v24, %v1489_v23 }
0x1d27   :  { %1946 = vtanh.f32 %v1499_v25 }
0x1d2d   :  { %v1947_v27 = vpop.eup %1946 }
0x1d2e   :  { %1502 = vrot.lane.b32.xlu2 %v1947_v27, %s1968_s26 }
0x1d88   :  { %v1503_v28 = vpop.permute.xlu2 %1502 }
0x1d89   :  { %v2305_v29 = vmul.f32 %v1503_v28, %v1486_v21  ;;  %v1660_v28 = vld [vmem:[%s2395_s6 + $0x48] sm:$0xff] }
0x1d8b   :  { %1513 = vrot.lane.b32.xlu0 %v2305_v29, %s1969_s27 }
0x1dfd   :  { %v1514_v30 = vpop.permute.xlu0 %1513 }
0x1dfe   :  { %1820 = vmatmul.msk.f32.vlgmr.msrb.gmra.mxu1 %vm497_vm3, %v1514_v30  ;;  %v1658_v30 = vld [vmem:[%s2395_s6 + $0x38] sm:$0xff] }
0x1e7b   :  { %v1534_v33 = vpop.f32.mrf.mxu1 }
0x1e7c   :  { %v1537_v34 = vadd.f32 %v1534_v33, %v1512_v31  ;;  %v1657_v33 = vld [vmem:[%s2395_s6 + $0x30] sm:$0xff] }
0x1e7e   :  { %1948 = vtanh.f32 %v1537_v34  ;;  %v1821_v36 = vmul.f32 -1.442695, %v1537_v34 }
0x1e80   :  { %1950 = vpow2.f32 %v1821_v36  ;;  %v1656_v36 = vld [vmem:[%s2395_s6 + $0x28] sm:$0xff] }
0x1e84   :  { %v1949_v35 = vpop.eup %1948 }
0x1e85   :  { %1560 = vrot.lane.b32.xlu1 %v1949_v35, %s1966_s25 }
0x1e86   :  { %v1951_v39 = vpop.eup %1950 }
0x1e87   :  { %v1541_v40 = vadd.f32 1.0, %v1951_v39  ;;  %v1655_v39 = vld [vmem:[%s2395_s6 + $0x20] sm:$0xff] }
0x1e89   :  { %1952 = vrcp.f32 %v1541_v40  ;;  %v1553_v47 = vand.u32 2147483648, %v1541_v40  ;;  %vm1547_vm12 = vweird.f32 %v1541_v40  ;;  %v1551_v48 = vand.u32 2147483647, %v1541_v40 }
0x1e8b   :  { %v1554_v50 = vor.u32 1.1754944e-38, %v1553_v47  ;;  %vm1552_vm14 = vcmp.eq.f32.partialorder %v1551_v48, 8.507059e+37  ;;  %v1652_v47 = vld [vmem:[%s2395_s6 + $0x8] sm:$0xff]  ;;  %v1651_v48 = vld [vmem:[%s2395_s6] sm:$0xff] }
0x1e8f   :  { %v1953_v41 = vpop.eup %1952 }
0x1e90   :  { %v1543_v42 = vmul.f32 %v1953_v41, %v1541_v40  ;;  %vm1548_vm11 = vweird.f32 %v1953_v41 }
0x1e91   :  { %vm1549_vm13 = vmor %vm1547_vm12, %vm1548_vm11  ;;  %vm1303_vm11 = vcmask 654912   ;;  %vm1372_vm12 = vcmask 720512  }
0x1e92   :  { %v1544_v43 = vsub.f32 1.0, %v1543_v42 }
0x1e94   :  { %v1545_v44 = vmul.f32 %v1953_v41, %v1544_v43 }
0x1e96   :  { %v1546_v46 = vadd.f32 %v1953_v41, %v1545_v44  ;;  %v1654_v44 = vld [vmem:[%s2395_s6 + $0x18] sm:$0xff] }
0x1e98   :  { %v1550_v49 = vsel %vm1549_vm13, %v1953_v41, %v1546_v46  ;;  %vm1441_vm13 = vcmask 786112   ;;  %v1653_v46 = vld [vmem:[%s2395_s6 + $0x10] sm:$0xff] }
0x1e99   :  { %v1555_v52 = vsel %vm1552_vm14, %v1554_v50, %v1550_v49  ;;  %vm1510_vm14 = vcmask 851712  }
0x1e9a   :  { %v1558_v55 = vmul.f32 %v1555_v52, %v1499_v25  ;;  %v1661_v25 = vld [vmem:[%s2395_s6 + $0x50] sm:$0xff] }
0x1ef7   :  { %v1561_v51 = vpop.permute.xlu1 %1560 }
0x1ef8   :  { %v1563_v54 = vmul.f32 %v1561_v51, %v1555_v52  ;;  %v1843_v51 = vld [vmem:[%s2394_s7] ss:$0 sm:$0xff] }
0x1efa   :  { %1565 = vrot.lane.b32.xlu2 %v1563_v54, %s1967_s5 }
0x1f54   :  { %v1566_v56 = vpop.permute.xlu2 %1565 }
0x1f55   :  { %v1568_v57 = vadd.f32 %v1566_v56, %v1558_v55 }
0x1f57   :  { %1954 = vtanh.f32 %v1568_v57 }
0x1f5d   :  { %v1955_v58 = vpop.eup %1954 }
0x1f5e   :  { %1571 = vrot.lane.b32.xlu0 %v1955_v58, %s1968_s26 }
0x1fd0   :  { %v1572_v59 = vpop.permute.xlu0 %1571 }
0x1fd1   :  { %v2313_v60 = vmul.f32 %v1572_v59, %v1555_v52 }
0x1fd3   :  { %1582 = vrot.lane.b32.xlu1 %v2313_v60, %s1969_s27 }
0x2045   :  { %v1583_v61 = vpop.permute.xlu1 %1582 }
0x2046   :  { %1822 = vmatmul.msk.f32.vlgmr.msra.gmra.mxu2 %vm497_vm3, %v1583_v61 }
0x20c9   :  { %v1603_v1 = vpop.f32.mrf.mxu2 }
0x20ca   :  { %v1606_v2 = vadd.f32 %v1603_v1, %v1581_v0 }
0x20cc   :  { %1956 = vtanh.f32 %v1606_v2  ;;  %v1823_v7 = vmul.f32 -1.442695, %v1606_v2 }
0x20ce   :  { %1958 = vpow2.f32 %v1823_v7 }
0x20d2   :  { %v1957_v4 = vpop.eup %1956 }
0x20d3   :  { %1629 = vrot.lane.b32.xlu2 %v1957_v4, %s1966_s25 }
0x20d4   :  { %v1959_v5 = vpop.eup %1958 }
0x20d5   :  { %v1610_v6 = vadd.f32 1.0, %v1959_v5 }
0x20d7   :  { %1960 = vrcp.f32 %v1610_v6  ;;  %vm1616_vm15 = vweird.f32 %v1610_v6 }
0x20db   :  { %751 = vrot.lane.b32.xlu2 %v2210_v37, %s1966_s25  ;;  %v1622_v37 = vand.u32 2147483648, %v1610_v6 }
0x20dd   :  { %v1961_v8 = vpop.eup %1960 }
0x20de   :  { %v1612_v10 = vmul.f32 %v1961_v8, %v1610_v6  ;;  %vm1617_vm3 = vweird.f32 %v1961_v8 }
0x20df   :  { %vm1618_vm0 = vmor %vm1616_vm15, %vm1617_vm3  ;;  %vm1579_vm3 = vcmask 917312   ;;  %vm1648_vm15 = vcmask 982912  }
0x20e0   :  { %v1613_v11 = vsub.f32 1.0, %v1612_v10 }
0x20e2   :  { %v1614_v12 = vmul.f32 %v1961_v8, %v1613_v11 }
0x20e3   :  { %1024 = vrot.lane.b32.xlu2 %v2246_v16, %s1968_s26  ;;  %v1620_v16 = vand.u32 2147483647, %v1610_v6 }
0x20e4   :  { %v1615_v13 = vadd.f32 %v1961_v8, %v1614_v12 }
0x20e5   :  { %vm1621_vm1 = vcmp.eq.f32.partialorder %v1620_v16, 8.507059e+37 }
0x20e6   :  { %v1619_v14 = vsel %vm1618_vm0, %v1961_v8, %v1615_v13  ;;  %vm1670_vm0 = vcmask 982016  }
0x20eb   :  { %1231 = vrot.lane.b32.xlu2 %v2273_v38, %s1970_s4  ;;  %v1623_v38 = vor.u32 1.1754944e-38, %v1622_v37 }
0x20f3   :  { %1438 = vrot.lane.b32.xlu2 %v2297_v62, %s1971_s30  ;;  %v1624_v62 = vsel %vm1621_vm1, %v1623_v38, %v1619_v14  ;;  %vm1694_vm1 = vcmask 15360  }
0x20f4   :  { %v1627_v19 = vmul.f32 %v1624_v62, %v1568_v57 }
0x212d   :  { %v1630_v15 = vpop.permute.xlu2 %1629 }
0x212e   :  { %v1632_v17 = vmul.f32 %v1630_v15, %v1624_v62 }
0x2130   :  { %1634 = vrot.lane.b32.xlu0 %v1632_v17, %s1967_s5 }
0x2135   :  { %v752_v18 = vpop.permute.xlu2 %751 }
0x2136   :  { %755 = vst.msk [vmem:[#allocation3] sm:$0xff] %vm754_vm2, %v752_v18 }
0x2138   :  { %820 = vrot.lane.b32.xlu0 %v2219_v63, %s1972_s9 }
0x2140   :  { %1093 = vrot.lane.b32.xlu0 %v2257_v45, %s1973_s10 }
0x2148   :  { %1300 = vrot.lane.b32.xlu0 %v2281_v3, %s1974_s11  ;;  %v1665_v3 = vld [vmem:[%s2395_s6 + $0x70] sm:$0xff] }
0x2149   :  { %1675 = vmatpush.msrb.mxu3 %v1665_v3 }
0x2150   :  { %1507 = vrot.lane.b32.xlu0 %v2305_v29, %s1975_s12  ;;  %v1659_v29 = vld [vmem:[%s2395_s6 + $0x40] sm:$0xff] }
0x21a2   :  { %v1635_v20 = vpop.permute.xlu0 %1634 }
0x21a3   :  { %v1637_v21 = vadd.f32 %v1635_v20, %v1627_v19 }
0x21a5   :  { %1962 = vtanh.f32 %v1637_v21 }
0x21aa   :  { %v821_v22 = vpop.permute.xlu0 %820 }
0x21ab   :  { %v1963_v23 = vpop.eup %1962  ;;  %824 = vst.msk [vmem:[#allocation3] sm:$0xff] %vm823_vm4, %v821_v22 }
0x21ac   :  { %1640 = vrot.lane.b32.xlu1 %v1963_v23, %s1968_s26  ;;  %889 = vst.msk [vmem:[#allocation3] sm:$0xff] %vm888_vm5, %v2228_v26  ;;  %v1664_v26 = vld [vmem:[%s2395_s6 + $0x68] sm:$0xff] }
0x21ad   :  { %1676 = vmatpush.msrb.mxu3 %v1664_v26 }
0x21b2   :  { %v1094_v24 = vpop.permute.xlu0 %1093 }
0x21b4   :  { %955 = vrot.lane.b32.xlu1 %v2237_v53, %s1967_s5  ;;  %v1663_v53 = vld [vmem:[%s2395_s6 + $0x60] sm:$0xff] }
0x21b5   :  { %1677 = vmatpush.msrb.mxu3 %v1663_v53 }
0x21ba   :  { %v1301_v34 = vpop.permute.xlu0 %1300 }
0x21bc   :  { %1162 = vrot.lane.b32.xlu1 %v2265_v9, %s1976_s13  ;;  %v1025_v9 = vpop.permute.xlu2 %1024 }
0x21c2   :  { %v1508_v42 = vpop.permute.xlu0 %1507 }
0x21c4   :  { %1369 = vrot.lane.b32.xlu1 %v2289_v32, %s1977_s14  ;;  %v1662_v32 = vld [vmem:[%s2395_s6 + $0x58] sm:$0xff]  ;;  %v1232_v31 = vpop.permute.xlu2 %1231 }
0x21c5   :  { %1678 = vmatpush.msrb.mxu3 %v1662_v32 }
0x21c7   :  { %1679 = vmatpush.msrb.mxu3 %v1661_v25 }
0x21c9   :  { %1680 = vmatpush.msrb.mxu3 %v1660_v28 }
0x21cb   :  { %1681 = vmatpush.msrb.mxu3 %v1659_v29 }
0x21cc   :  { %1576 = vrot.lane.b32.xlu1 %v2313_v60, %s1978_s15  ;;  %v1439_v41 = vpop.permute.xlu2 %1438 }
0x21cd   :  { %1682 = vmatpush.msrb.mxu3 %v1658_v30 }
0x21cf   :  { %1683 = vmatpush.msrb.mxu3 %v1657_v33 }
0x21d1   :  { %1684 = vmatpush.msrb.mxu3 %v1656_v36 }
0x21d3   :  { %1685 = vmatpush.msrb.mxu3 %v1655_v39 }
0x21d5   :  { %1686 = vmatpush.msrb.mxu3 %v1654_v44 }
0x21d7   :  { %1687 = vmatpush.msrb.mxu3 %v1653_v46 }
0x21d9   :  { %1688 = vmatpush.msrb.mxu3 %v1652_v47 }
0x21db   :  { %1689 = vmatpush.msrb.mxu3 %v1651_v48 }
0x221e   :  { %v1641_v63 = vpop.permute.xlu1 %1640 }
0x221f   :  { %v1643_v45 = vmul.f32 %v1641_v63, %v1624_v62 }
0x2221   :  { %1645 = vrot.lane.b32.xlu2 %v1643_v45, %s1979_s19 }
0x2226   :  { %v956_v27 = vpop.permute.xlu1 %955 }
0x2227   :  { %959 = vst.msk [vmem:[#allocation3] sm:$0xff] %vm958_vm6, %v956_v27 }
0x2228   :  { %1028 = vst.msk [vmem:[#allocation3] sm:$0xff] %vm1027_vm7, %v1025_v9 }
0x2229   :  { %1097 = vst.msk [vmem:[#allocation3] sm:$0xff] %vm1096_vm8, %v1094_v24 }
0x222e   :  { %v1163_v35 = vpop.permute.xlu1 %1162 }
0x222f   :  { %1166 = vst.msk [vmem:[#allocation3] sm:$0xff] %vm1165_vm9, %v1163_v35 }
0x2230   :  { %1235 = vst.msk [vmem:[#allocation3] sm:$0xff] %vm1234_vm10, %v1232_v31 }
0x2231   :  { %1304 = vst.msk [vmem:[#allocation3] sm:$0xff] %vm1303_vm11, %v1301_v34 }
0x2236   :  { %v1370_v40 = vpop.permute.xlu1 %1369 }
0x2237   :  { %1373 = vst.msk [vmem:[#allocation3] sm:$0xff] %vm1372_vm12, %v1370_v40 }
0x2238   :  { %1442 = vst.msk [vmem:[#allocation3] sm:$0xff] %vm1441_vm13, %v1439_v41 }
0x2239   :  { %1511 = vst.msk [vmem:[#allocation3] sm:$0xff] %vm1510_vm14, %v1508_v42 }
0x223e   :  { %v1577_v43 = vpop.permute.xlu1 %1576 }
0x223f   :  { %1580 = vst.msk [vmem:[#allocation3] sm:$0xff] %vm1579_vm3, %v1577_v43 }
0x227b   :  { %v1646_v49 = vpop.permute.xlu2 %1645 }
0x227c   :  { %1649 = vst.msk [vmem:[#allocation3] sm:$0xff] %vm1648_vm15, %v1646_v49 }
0x2283   :  { %v1650_v50 = vld [vmem:[#allocation3] sm:$0xff] }
0x2284   :  { %1824 = vmatmul.msk.f32.vlgmr.msrb.gmra.mxu3 %vm1670_vm0, %v1650_v50 }
0x2307   :  { %v1691_v52 = vpop.f32.mrf.mxu3 }
0x2308   :  { %v1692_v54 = vadd.f32 %v1843_v51, %v1691_v52 }
0x230a   :  { %1695 = vst.msk [vmem:[%s2396_s8] sm:$0xff] %vm1694_vm1, %v1692_v54 }

</bundles_post_ra>
